<compile_context>
chip_gen: v7x
topology: tpu7x:2x2x1
jax: 0.10.0
libtpu: 0.0.40
codegen_flags: <defaults>
</compile_context>

<pallas_src>
import functools

import jax
import jax.numpy as jnp
from jax.experimental import pallas as pl
from jax.experimental.pallas import tpu as pltpu

# ----------------------------- config (small, lane-dense) --------------------------
B = 2              # batch
S = 8              # sequence length
H = 128            # bert hidden size (bert-base would be 768); multiple of 128
N_HEADS = 2
D_HEAD = H // N_HEADS
FFN = 2 * H        # intermediate size (256)
N_LAYERS = 2
VOCAB = 50
MAX_POS = 16
G2V = 128          # gene2vec_hidden (module default 200, sized to the 128-lane axis)
FUSION_HID = 128   # Gene2VecFusionModel hidden_size (module default 500, scaled down)
N_LABELS = 4       # classification head
LN_EPS = 1e-12

# packed encoder bias-slab rows (lane width 3H)
_R_BQKV, _R_BO, _R_B1, _R_B2, _R_LN1G, _R_LN1B, _R_LN2G, _R_LN2B = range(8)
# packed head bias-slab rows (lane width H)
_R_POOLB, _R_BE1, _R_BE2, _R_BF1, _R_BF2, _R_HEADB = range(6)
# head weight-stack indices
_W_POOL, _W_E1, _W_E2, _W_F1A, _W_F1B, _W_F2 = range(6)


# ----------------------------- shared in-kernel helpers ----------------------------
def _layernorm(x, g, b, eps):
    mu = jnp.mean(x, axis=-1, keepdims=True)
    var = jnp.mean((x - mu) ** 2, axis=-1, keepdims=True)
    return (x - mu) * jax.lax.rsqrt(var + eps) * g + b


def _bf16(x):
    return x.astype(jnp.bfloat16)


# ----------------------------- kernel 1: full BERT encoder -------------------------
def bert_encoder_kernel(x_emb_ref, amask_ref, emb_ln_ref,
                        wqkv_ref, wo_ref, w1_ref, w2_ref, bias_ref,
                        o_ref, x_scr, *, n_heads, d_head, eps):
    """One grid step == one (batch element, transformer layer).

    Activations persist in `x_scr` (VMEM) across the layer axis; layer weights are
    streamed via the stacked leading [L, ...] axis (BlockSpec auto double-buffers the
    next layer's weights behind the current layer's compute).  Only the final layer
    writes the hidden tile back to HBM.
    """
    layer = pl.program_id(1)
    n_layers = pl.num_programs(1)
    h_dim = n_heads * d_head

    # --- layer step 0 for this batch element: embedding LayerNorm (no residual) ---
    @pl.when(layer == 0)
    def _():
        x_scr[...] = _layernorm(x_emb_ref[0], emb_ln_ref[0:1, :],
                                emb_ln_ref[1:2, :], eps)

    x = x_scr[...]                                   # [S, H] f32
    xb = _bf16(x)
    bias = bias_ref[0]                               # [8, 3H] packed f32 slab

    # --- fused QKV projection: one [S,H] @ [H,3H] MXU pass ---
    qkv = jnp.dot(xb, wqkv_ref[0], preferred_element_type=jnp.float32)
    qkv = qkv + bias[_R_BQKV:_R_BQKV + 1, :]
    qkv_b = _bf16(qkv)                               # single cast (v5e: no bf16 VPU path)

    amask = amask_ref[0]                             # [1, S] additive mask (precomputed)
    scale = 1.0 / (d_head ** 0.5)

    ctx_parts = []
    for h in range(n_heads):                         # static unroll (tiny head count)
        lo = h * d_head
        qh = qkv_b[:, lo:lo + d_head]
        kh = qkv_b[:, h_dim + lo:h_dim + lo + d_head]
        vh = qkv_b[:, 2 * h_dim + lo:2 * h_dim + lo + d_head]
        s = jax.lax.dot_general(qh, kh, (((1,), (1,)), ((), ())),
                                preferred_element_type=jnp.float32) * scale
        s = s + amask
        s = s - jnp.max(s, axis=-1, keepdims=True)
        p = jnp.exp(s)
        p = p / jnp.sum(p, axis=-1, keepdims=True)
        ctx_parts.append(jnp.dot(_bf16(p), vh, preferred_element_type=jnp.float32))
    ctx = _bf16(jnp.concatenate(ctx_parts, axis=1))  # [S, H]

    # --- output projection: one [S,H] @ [H,H] MXU pass ---
    attn = jnp.dot(ctx, wo_ref[0], preferred_element_type=jnp.float32)
    attn = attn + bias[_R_BO:_R_BO + 1, :h_dim]

    # residual + LayerNorm 1
    h1 = _layernorm(x + attn, bias[_R_LN1G:_R_LN1G + 1, :h_dim],
                    bias[_R_LN1B:_R_LN1B + 1, :h_dim], eps)

    # feed-forward + residual + LayerNorm 2 (all in VMEM)
    ffn_dim = w1_ref.shape[-1]
    f = jnp.dot(_bf16(h1), w1_ref[0], preferred_element_type=jnp.float32)
    f = f + bias[_R_B1:_R_B1 + 1, :ffn_dim]
    # TODO(synk): HF BERT uses erf-GELU; tanh approximation used for robust Mosaic lowering.
    f = jax.nn.gelu(f, approximate=True)
    f = jnp.dot(_bf16(f), w2_ref[0], preferred_element_type=jnp.float32)
    f = f + bias[_R_B2:_R_B2 + 1, :h_dim]

    out = _layernorm(h1 + f, bias[_R_LN2G:_R_LN2G + 1, :h_dim],
                     bias[_R_LN2B:_R_LN2B + 1, :h_dim], eps)
    x_scr[...] = out

    @pl.when(layer == n_layers - 1)
    def _():
        o_ref[0] = out


def pallas_bert_encoder(x_emb, attn_bias, params):
    enc = params["encoder"]
    kernel = functools.partial(bert_encoder_kernel,
                               n_heads=N_HEADS, d_head=D_HEAD, eps=LN_EPS)
    return pl.pallas_call(
        kernel,
        out_shape=jax.ShapeDtypeStruct((B, S, H), jnp.float32),
        grid_spec=pltpu.PrefetchScalarGridSpec(
            num_scalar_prefetch=0,
            grid=(B, N_LAYERS),
            in_specs=[
                pl.BlockSpec((1, S, H), lambda b, l: (b, 0, 0)),        # embeddings (pre-LN)
                pl.BlockSpec((1, 1, S), lambda b, l: (b, 0, 0)),        # additive attn mask
                pl.BlockSpec((2, H), lambda b, l: (0, 0)),              # emb LN gamma/beta
                pl.BlockSpec((1, H, 3 * H), lambda b, l: (l, 0, 0)),    # fused QKV weights
                pl.BlockSpec((1, H, H), lambda b, l: (l, 0, 0)),        # attn output proj
                pl.BlockSpec((1, H, FFN), lambda b, l: (l, 0, 0)),      # FFN w1
                pl.BlockSpec((1, FFN, H), lambda b, l: (l, 0, 0)),      # FFN w2
                pl.BlockSpec((1, 8, 3 * H), lambda b, l: (l, 0, 0)),    # packed bias/LN slab
            ],
            out_specs=pl.BlockSpec((1, S, H), lambda b, l: (b, 0, 0)),
            scratch_shapes=[pltpu.VMEM((S, H), jnp.float32)],           # persistent acts
        ),
        compiler_params=pltpu.CompilerParams(
            dimension_semantics=("parallel", "arbitrary")),
    )(x_emb, attn_bias, enc["emb_ln"],
      enc["wqkv"], enc["wo"], enc["w1"], enc["w2"], enc["bias"])


# ----------------------------- kernel 2: pooling + gene2vec fusion + head ----------
def pooled_head_kernel(hidden_ref, mask_ref, g2v_ref, wstack_ref, hbias_ref, head_w_ref,
                       emb_ref, logits_ref, *, pool, use_g2v):
    """Masked pooling + Gene2VecFusionModel + classification Linear for one batch row."""
    h = hidden_ref[0]                    # [S, H] f32
    m = mask_ref[0]                      # [S, 1] f32
    hb = hbias_ref[...]                  # [8, H] f32 packed bias slab

    if pool == "mean":
        denom = jnp.maximum(jnp.sum(m, axis=0, keepdims=True), 1e-9)
        pooled = jnp.sum(h * m, axis=0, keepdims=True) / denom          # [1, H]
    elif pool == "sum":
        pooled = jnp.sum(h * m, axis=0, keepdims=True)
    elif pool == "max":
        pooled = jnp.max(jnp.where(m == 0.0, -1e9, h), axis=0, keepdims=True)
    elif pool == "cls":
        cls = h[0:1, :]
        pooled = jnp.tanh(jnp.dot(_bf16(cls), wstack_ref[_W_POOL],
                                  preferred_element_type=jnp.float32)
                          + hb[_R_POOLB:_R_POOLB + 1, :])
    else:
        raise ValueError("Pooling value error.")

    emb = pooled
    if use_g2v:
        g = g2v_ref[0]                   # [1, G2V]
        e1 = jnp.dot(_bf16(pooled), wstack_ref[_W_E1],
                     preferred_element_type=jnp.float32) + hb[_R_BE1:_R_BE1 + 1, :]
        e2 = jnp.dot(_bf16(g), wstack_ref[_W_E2],
                     preferred_element_type=jnp.float32) + hb[_R_BE2:_R_BE2 + 1, :]
        # fc1(cat([e1, e2], dim=1)) == e1 @ Wfc1[:hid] + e2 @ Wfc1[hid:]
        z = (jnp.dot(_bf16(e1), wstack_ref[_W_F1A], preferred_element_type=jnp.float32)
             + jnp.dot(_bf16(e2), wstack_ref[_W_F1B], preferred_element_type=jnp.float32)
             + hb[_R_BF1:_R_BF1 + 1, :])
        z = jnp.maximum(z, 0.0)
        z = jnp.dot(_bf16(z), wstack_ref[_W_F2],
                    preferred_element_type=jnp.float32) + hb[_R_BF2:_R_BF2 + 1, :]
        emb = jnp.maximum(z, 0.0)

    n_labels = logits_ref.shape[-1]
    emb_ref[0] = emb
    logits_ref[0] = (jnp.dot(_bf16(emb), head_w_ref[...],
                             preferred_element_type=jnp.float32)
                     + hb[_R_HEADB:_R_HEADB + 1, 0:n_labels])


def pallas_pooled_head(hidden, mask_bs1, gene2vec, params, pool, use_g2v):
    hd = params["head"]
    kernel = functools.partial(pooled_head_kernel, pool=pool, use_g2v=use_g2v)
    emb3, logits3 = pl.pallas_call(
        kernel,
        out_shape=(jax.ShapeDtypeStruct((B, 1, H), jnp.float32),
                   jax.ShapeDtypeStruct((B, 1, N_LABELS), jnp.float32)),
        grid_spec=pltpu.PrefetchScalarGridSpec(
            num_scalar_prefetch=0,
            grid=(B,),
            in_specs=[
                pl.BlockSpec((1, S, H), lambda b: (b, 0, 0)),                 # hidden
                pl.BlockSpec((1, S, 1), lambda b: (b, 0, 0)),                 # mask
                pl.BlockSpec((1, 1, G2V), lambda b: (b, 0, 0)),               # gene2vec
                pl.BlockSpec((6, FUSION_HID, FUSION_HID), lambda b: (0, 0, 0)),  # weight stack
                pl.BlockSpec((8, H), lambda b: (0, 0)),                       # bias slab
                pl.BlockSpec((H, N_LABELS), lambda b: (0, 0)),                # head weight
            ],
            out_specs=(pl.BlockSpec((1, 1, H), lambda b: (b, 0, 0)),
                       pl.BlockSpec((1, 1, N_LABELS), lambda b: (b, 0, 0))),
        ),
        compiler_params=pltpu.CompilerParams(dimension_semantics=("parallel",)),
    )(hidden, mask_bs1, gene2vec[:, None, :],
      hd["wstack"], hd["bias"], hd["head_w"])
    return emb3[:, 0, :], logits3[:, 0, :]


# ----------------------------- parameters ------------------------------------------
def init_params(key):
    keys = iter(jax.random.split(key, 32))

    def nrm(*shape):
        return jax.random.normal(next(keys), shape, dtype=jnp.float32) * 0.02

    # TODO(synk): pretrained `AutoModel.from_pretrained` weights replaced by
    # deterministic random init (synthetic encoder, no checkpoint load).
    wqkv = jnp.stack([nrm(H, 3 * H) for _ in range(N_LAYERS)]).astype(jnp.bfloat16)
    wo = jnp.stack([nrm(H, H) for _ in range(N_LAYERS)]).astype(jnp.bfloat16)
    w1 = jnp.stack([nrm(H, FFN) for _ in range(N_LAYERS)]).astype(jnp.bfloat16)
    w2 = jnp.stack([nrm(FFN, H) for _ in range(N_LAYERS)]).astype(jnp.bfloat16)

    # packed per-layer bias / LayerNorm slab [L, 8, 3H]:
    #   row0 bq|bk|bv  row1 bo  row2 b1(FFN)  row3 b2
    #   row4 ln1_gamma row5 ln1_beta row6 ln2_gamma row7 ln2_beta
    slab = jnp.zeros((8, 3 * H), jnp.float32)
    slab = slab.at[_R_LN1G, :H].set(1.0)
    slab = slab.at[_R_LN2G, :H].set(1.0)
    bias = jnp.tile(slab[None], (N_LAYERS, 1, 1))

    emb_ln = jnp.stack([jnp.ones((H,), jnp.float32), jnp.zeros((H,), jnp.float32)])

    # head: stacked bf16 [6, 128, 128] weights + [8, H] f32 bias slab + [H, n_labels]
    wstack = jnp.stack([
        nrm(H, H),                      # BERT pooler dense (cls path)
        nrm(H, FUSION_HID),             # fusion embedding1
        nrm(G2V, FUSION_HID),           # fusion embedding2
        nrm(FUSION_HID, FUSION_HID),    # fc1 rows applied to x1
        nrm(FUSION_HID, FUSION_HID),    # fc1 rows applied to x2
        nrm(FUSION_HID, H),             # fc2
    ]).astype(jnp.bfloat16)
    head_bias = jnp.zeros((8, H), jnp.float32)
    head_w = nrm(H, N_LABELS).astype(jnp.bfloat16)

    return dict(
        word_emb=nrm(VOCAB, H),
        pos_emb=nrm(MAX_POS, H),
        type_emb=nrm(2, H),
        encoder=dict(emb_ln=emb_ln, wqkv=wqkv, wo=wo, w1=w1, w2=w2, bias=bias),
        head=dict(wstack=wstack, bias=head_bias, head_w=head_w),
    )


# ----------------------------- forward pass -----------------------------------------
@functools.partial(jax.jit, static_argnames=("pool", "use_g2v"))
def _forward(params, input_ids, attention_mask, gene2vec, pool, use_g2v):
    mask_f = attention_mask.astype(jnp.float32)          # [B, S]

    # BERT embeddings (gathers are glue; LayerNorm fused into encoder step 0)
    word = params["word_emb"][input_ids]                 # [B, S, H]
    pos = params["pos_emb"][:S][None, :, :]              # [1, S, H]
    typ = params["type_emb"][0][None, None, :]           # token_type_ids == 0
    x_emb = word + pos + typ                             # [B, S, H]

    # additive attention-mask bias, computed once (hoisted out of all kernel loops)
    attn_bias = (1.0 - mask_f)[:, None, :] * (-1e9)      # [B, 1, S]

    # --- encoder: ONE fused pallas_call over grid=(batch, layers) ---
    hidden_state = pallas_bert_encoder(x_emb, attn_bias, params)   # [B, S, H]

    # --- pooling + gene2vec fusion + classification head: one fused kernel ---
    embeddings, logits = pallas_pooled_head(
        hidden_state, mask_f[..., None], gene2vec, params, pool, use_g2v)

    return embeddings, hidden_state, logits


def finetuned_bert_forward(params, input_ids, attention_mask, gene2vec=None, pool="mean"):
    use_g2v = gene2vec is not None
    if gene2vec is None:
        gene2vec = jnp.zeros((input_ids.shape[0], G2V), jnp.float32)
    return _forward(params, input_ids, attention_mask, gene2vec, pool, use_g2v)


# ----------------------------- main --------------------------------------------------
if __name__ == "__main__":
    key = jax.random.PRNGKey(0)
    k_param, k_ids, k_g2v = jax.random.split(key, 3)

    params = init_params(k_param)

    input_ids = jax.random.randint(k_ids, (B, S), 0, VOCAB, dtype=jnp.int32)
    attention_mask = jnp.array([[1, 1, 1, 1, 1, 1, 0, 0],
                                [1, 1, 1, 1, 0, 0, 0, 0]], dtype=jnp.int32)
    gene2vec = jax.random.normal(k_g2v, (B, G2V), dtype=jnp.float32)

    embeddings, hidden_state, logits = finetuned_bert_forward(
        params, input_ids, attention_mask, gene2vec=gene2vec, pool="mean")

    jax.block_until_ready((embeddings, hidden_state, logits))

    assert embeddings.shape == (B, H)
    assert hidden_state.shape == (B, S, H)
    assert logits.shape == (B, N_LABELS)
    print("KERNEL_OK")
</pallas_src>

<mosaic_0001>
module attributes {stable_mosaic.version = 11 : i64} {
  func.func @pooled_head_kernel(%arg0: i32, %arg1: memref<1x8x128xf32, #tpu.memory_space<vmem>>, %arg2: memref<1x8x1xf32, #tpu.memory_space<vmem>>, %arg3: memref<1x1x128xf32, #tpu.memory_space<vmem>>, %arg4: memref<6x128x128xbf16, #tpu.memory_space<vmem>>, %arg5: memref<8x128xf32, #tpu.memory_space<vmem>>, %arg6: memref<128x4xbf16, #tpu.memory_space<vmem>>, %arg7: memref<1x1x128xf32, #tpu.memory_space<vmem>>, %arg8: memref<1x1x4xf32, #tpu.memory_space<vmem>>) attributes {dimension_semantics = [#tpu.dimension_semantics<parallel>], iteration_bounds = array<i64: 2>, scalar_prefetch = 0 : i64, scratch_operands = 0 : i64, tpu.core_type = #tpu.core_type<tc>, window_params = [{transform_indices = @transform_0, window_bounds = array<i64: 1, 8, 128>}, {transform_indices = @transform_1, window_bounds = array<i64: 1, 8, 1>}, {transform_indices = @transform_2, window_bounds = array<i64: 1, 1, 128>}, {pipeline_mode = #tpu.pipeline_mode<synchronous>, transform_indices = @transform_3, window_bounds = array<i64: 6, 128, 128>}, {pipeline_mode = #tpu.pipeline_mode<synchronous>, transform_indices = @transform_4, window_bounds = array<i64: 8, 128>}, {pipeline_mode = #tpu.pipeline_mode<synchronous>, transform_indices = @transform_5, window_bounds = array<i64: 128, 4>}, {transform_indices = @transform_6, window_bounds = array<i64: 1, 1, 128>}, {transform_indices = @transform_7, window_bounds = array<i64: 1, 1, 4>}]} {
    %c0 = arith.constant 0 : index
    %c0_0 = arith.constant 0 : index
    %c0_1 = arith.constant 0 : index
    %0 = vector.load %arg1[%c0, %c0_0, %c0_1] : memref<1x8x128xf32, #tpu.memory_space<vmem>>, vector<1x8x128xf32>
    %1 = vector.shape_cast %0 : vector<1x8x128xf32> to vector<8x128xf32>
    %c0_2 = arith.constant 0 : index
    %c0_3 = arith.constant 0 : index
    %c0_4 = arith.constant 0 : index
    %2 = vector.load %arg2[%c0_2, %c0_3, %c0_4] : memref<1x8x1xf32, #tpu.memory_space<vmem>>, vector<1x8x1xf32>
    %3 = vector.shape_cast %2 : vector<1x8x1xf32> to vector<8x1xf32>
    %c0_5 = arith.constant 0 : index
    %c0_6 = arith.constant 0 : index
    %4 = vector.load %arg5[%c0_5, %c0_6] : memref<8x128xf32, #tpu.memory_space<vmem>>, vector<8x128xf32>
    %cst = arith.constant dense<0.000000e+00> : vector<1xf32>
    %5 = vector.multi_reduction <add>, %3, %cst [0] : vector<8x1xf32> to vector<1xf32>
    %6 = vector.shape_cast %5 : vector<1xf32> to vector<1x1xf32>
    %cst_7 = arith.constant 9.99999971E-10 : f32
    %7 = vector.broadcast %cst_7 : f32 to vector<1x1xf32>
    %8 = arith.maximumf %6, %7 : vector<1x1xf32>
    %9 = vector.broadcast %3 : vector<8x1xf32> to vector<8x128xf32>
    %10 = arith.mulf %1, %9 : vector<8x128xf32>
    %cst_8 = arith.constant dense<0.000000e+00> : vector<128xf32>
    %11 = vector.multi_reduction <add>, %10, %cst_8 [0] : vector<8x128xf32> to vector<128xf32>
    %12 = vector.shape_cast %11 : vector<128xf32> to vector<1x128xf32>
    %13 = vector.broadcast %8 : vector<1x1xf32> to vector<1x128xf32>
    %14 = arith.divf %12, %13 : vector<1x128xf32>
    %c0_9 = arith.constant 0 : index
    %c0_10 = arith.constant 0 : index
    %c0_11 = arith.constant 0 : index
    %15 = vector.load %arg3[%c0_9, %c0_10, %c0_11] : memref<1x1x128xf32, #tpu.memory_space<vmem>>, vector<1x1x128xf32>
    %16 = vector.shape_cast %15 : vector<1x1x128xf32> to vector<1x128xf32>
    %17 = arith.truncf %14 : vector<1x128xf32> to vector<1x128xbf16>
    %c1 = arith.constant 1 : index
    %c0_12 = arith.constant 0 : index
    %c0_13 = arith.constant 0 : index
    %18 = vector.load %arg4[%c1, %c0_12, %c0_13] : memref<6x128x128xbf16, #tpu.memory_space<vmem>>, vector<1x128x128xbf16>
    %19 = vector.shape_cast %18 : vector<1x128x128xbf16> to vector<128x128xbf16>
    %cst_14 = arith.constant dense<0.000000e+00> : vector<1x128xf32>
    %20 = tpu.matmul %17, %19, %cst_14 {dimension_numbers = #tpu.dot_dimension_numbers<[1], [0], [0], [1], [0, 0, 1, 1], [], []>} : vector<1x128xbf16>, vector<128x128xbf16>, vector<1x128xf32> -> vector<1x128xf32>
    %21 = vector.extract_strided_slice %4 {offsets = [1, 0], sizes = [1, 128], strides = [1, 1]} : vector<8x128xf32> to vector<1x128xf32>
    %22 = arith.addf %20, %21 : vector<1x128xf32>
    %23 = arith.truncf %16 : vector<1x128xf32> to vector<1x128xbf16>
    %c2 = arith.constant 2 : index
    %c0_15 = arith.constant 0 : index
    %c0_16 = arith.constant 0 : index
    %24 = vector.load %arg4[%c2, %c0_15, %c0_16] : memref<6x128x128xbf16, #tpu.memory_space<vmem>>, vector<1x128x128xbf16>
    %25 = vector.shape_cast %24 : vector<1x128x128xbf16> to vector<128x128xbf16>
    %cst_17 = arith.constant dense<0.000000e+00> : vector<1x128xf32>
    %26 = tpu.matmul %23, %25, %cst_17 {dimension_numbers = #tpu.dot_dimension_numbers<[1], [0], [0], [1], [0, 0, 1, 1], [], []>} : vector<1x128xbf16>, vector<128x128xbf16>, vector<1x128xf32> -> vector<1x128xf32>
    %27 = vector.extract_strided_slice %4 {offsets = [2, 0], sizes = [1, 128], strides = [1, 1]} : vector<8x128xf32> to vector<1x128xf32>
    %28 = arith.addf %26, %27 : vector<1x128xf32>
    %29 = arith.truncf %22 : vector<1x128xf32> to vector<1x128xbf16>
    %c3 = arith.constant 3 : index
    %c0_18 = arith.constant 0 : index
    %c0_19 = arith.constant 0 : index
    %30 = vector.load %arg4[%c3, %c0_18, %c0_19] : memref<6x128x128xbf16, #tpu.memory_space<vmem>>, vector<1x128x128xbf16>
    %31 = vector.shape_cast %30 : vector<1x128x128xbf16> to vector<128x128xbf16>
    %cst_20 = arith.constant dense<0.000000e+00> : vector<1x128xf32>
    %32 = tpu.matmul %29, %31, %cst_20 {dimension_numbers = #tpu.dot_dimension_numbers<[1], [0], [0], [1], [0, 0, 1, 1], [], []>} : vector<1x128xbf16>, vector<128x128xbf16>, vector<1x128xf32> -> vector<1x128xf32>
    %33 = arith.truncf %28 : vector<1x128xf32> to vector<1x128xbf16>
    %c4 = arith.constant 4 : index
    %c0_21 = arith.constant 0 : index
    %c0_22 = arith.constant 0 : index
    %34 = vector.load %arg4[%c4, %c0_21, %c0_22] : memref<6x128x128xbf16, #tpu.memory_space<vmem>>, vector<1x128x128xbf16>
    %35 = vector.shape_cast %34 : vector<1x128x128xbf16> to vector<128x128xbf16>
    %cst_23 = arith.constant dense<0.000000e+00> : vector<1x128xf32>
    %36 = tpu.matmul %33, %35, %cst_23 {dimension_numbers = #tpu.dot_dimension_numbers<[1], [0], [0], [1], [0, 0, 1, 1], [], []>} : vector<1x128xbf16>, vector<128x128xbf16>, vector<1x128xf32> -> vector<1x128xf32>
    %37 = arith.addf %32, %36 : vector<1x128xf32>
    %38 = vector.extract_strided_slice %4 {offsets = [3, 0], sizes = [1, 128], strides = [1, 1]} : vector<8x128xf32> to vector<1x128xf32>
    %39 = arith.addf %37, %38 : vector<1x128xf32>
    %cst_24 = arith.constant 0.000000e+00 : f32
    %40 = vector.broadcast %cst_24 : f32 to vector<1x128xf32>
    %41 = arith.maximumf %39, %40 : vector<1x128xf32>
    %42 = arith.truncf %41 : vector<1x128xf32> to vector<1x128xbf16>
    %c5 = arith.constant 5 : index
    %c0_25 = arith.constant 0 : index
    %c0_26 = arith.constant 0 : index
    %43 = vector.load %arg4[%c5, %c0_25, %c0_26] : memref<6x128x128xbf16, #tpu.memory_space<vmem>>, vector<1x128x128xbf16>
    %44 = vector.shape_cast %43 : vector<1x128x128xbf16> to vector<128x128xbf16>
    %cst_27 = arith.constant dense<0.000000e+00> : vector<1x128xf32>
    %45 = tpu.matmul %42, %44, %cst_27 {dimension_numbers = #tpu.dot_dimension_numbers<[1], [0], [0], [1], [0, 0, 1, 1], [], []>} : vector<1x128xbf16>, vector<128x128xbf16>, vector<1x128xf32> -> vector<1x128xf32>
    %46 = vector.extract_strided_slice %4 {offsets = [4, 0], sizes = [1, 128], strides = [1, 1]} : vector<8x128xf32> to vector<1x128xf32>
    %47 = arith.addf %45, %46 : vector<1x128xf32>
    %cst_28 = arith.constant 0.000000e+00 : f32
    %48 = vector.broadcast %cst_28 : f32 to vector<1x128xf32>
    %49 = arith.maximumf %47, %48 : vector<1x128xf32>
    %c0_29 = arith.constant 0 : index
    %c0_30 = arith.constant 0 : index
    %c0_31 = arith.constant 0 : index
    %50 = vector.load %arg7[%c0_29, %c0_30, %c0_31] : memref<1x1x128xf32, #tpu.memory_space<vmem>>, vector<1x1x128xf32>
    %51 = vector.shape_cast %50 : vector<1x1x128xf32> to vector<1x128xf32>
    %52 = vector.shape_cast %49 : vector<1x128xf32> to vector<1x1x128xf32>
    tpu.vector_store %arg7[%c0_29, %c0_30, %c0_31], %52 {strides = array<i32>} : memref<1x1x128xf32, #tpu.memory_space<vmem>>, vector<1x1x128xf32>,
    %53 = arith.truncf %49 : vector<1x128xf32> to vector<1x128xbf16>
    %c0_32 = arith.constant 0 : index
    %c0_33 = arith.constant 0 : index
    %54 = vector.load %arg6[%c0_32, %c0_33] : memref<128x4xbf16, #tpu.memory_space<vmem>>, vector<128x4xbf16>
    %cst_34 = arith.constant dense<0.000000e+00> : vector<1x4xf32>
    %55 = tpu.matmul %53, %54, %cst_34 {dimension_numbers = #tpu.dot_dimension_numbers<[1], [0], [0], [1], [0, 0, 1, 1], [], []>} : vector<1x128xbf16>, vector<128x4xbf16>, vector<1x4xf32> -> vector<1x4xf32>
    %56 = vector.extract_strided_slice %4 {offsets = [5, 0], sizes = [1, 4], strides = [1, 1]} : vector<8x128xf32> to vector<1x4xf32>
    %57 = arith.addf %55, %56 : vector<1x4xf32>
    %c0_35 = arith.constant 0 : index
    %c0_36 = arith.constant 0 : index
    %c0_37 = arith.constant 0 : index
    %58 = vector.load %arg8[%c0_35, %c0_36, %c0_37] : memref<1x1x4xf32, #tpu.memory_space<vmem>>, vector<1x1x4xf32>
    %59 = vector.shape_cast %58 : vector<1x1x4xf32> to vector<1x4xf32>
    %60 = vector.shape_cast %57 : vector<1x4xf32> to vector<1x1x4xf32>
    tpu.vector_store %arg8[%c0_35, %c0_36, %c0_37], %60 {strides = array<i32>} : memref<1x1x4xf32, #tpu.memory_space<vmem>>, vector<1x1x4xf32>,
    return
  }
  func.func @transform_0(%arg0: i32) -> (i32, i32, i32) {
    %c0_i32 = arith.constant 0 : i32
    %c0_i32_0 = arith.constant 0 : i32
    %c0_i32_1 = arith.constant 0 : i32
    return %arg0, %c0_i32, %c0_i32_0 : i32, i32, i32
  }
  func.func @transform_1(%arg0: i32) -> (i32, i32, i32) {
    %c0_i32 = arith.constant 0 : i32
    %c0_i32_0 = arith.constant 0 : i32
    %c0_i32_1 = arith.constant 0 : i32
    return %arg0, %c0_i32, %c0_i32_0 : i32, i32, i32
  }
  func.func @transform_2(%arg0: i32) -> (i32, i32, i32) {
    %c0_i32 = arith.constant 0 : i32
    %c0_i32_0 = arith.constant 0 : i32
    %c0_i32_1 = arith.constant 0 : i32
    return %arg0, %c0_i32, %c0_i32_0 : i32, i32, i32
  }
  func.func @transform_3(%arg0: i32) -> (i32, i32, i32) {
    %c0_i32 = arith.constant 0 : i32
    %c0_i32_0 = arith.constant 0 : i32
    %c0_i32_1 = arith.constant 0 : i32
    %c0_i32_2 = arith.constant 0 : i32
    return %c0_i32, %c0_i32_0, %c0_i32_1 : i32, i32, i32
  }
  func.func @transform_4(%arg0: i32) -> (i32, i32) {
    %c0_i32 = arith.constant 0 : i32
    %c0_i32_0 = arith.constant 0 : i32
    %c0_i32_1 = arith.constant 0 : i32
    return %c0_i32, %c0_i32_0 : i32, i32
  }
  func.func @transform_5(%arg0: i32) -> (i32, i32) {
    %c0_i32 = arith.constant 0 : i32
    %c0_i32_0 = arith.constant 0 : i32
    %c0_i32_1 = arith.constant 0 : i32
    return %c0_i32, %c0_i32_0 : i32, i32
  }
  func.func @transform_6(%arg0: i32) -> (i32, i32, i32) {
    %c0_i32 = arith.constant 0 : i32
    %c0_i32_0 = arith.constant 0 : i32
    %c0_i32_1 = arith.constant 0 : i32
    return %arg0, %c0_i32, %c0_i32_0 : i32, i32, i32
  }
  func.func @transform_7(%arg0: i32) -> (i32, i32, i32) {
    %c0_i32 = arith.constant 0 : i32
    %c0_i32_0 = arith.constant 0 : i32
    %c0_i32_1 = arith.constant 0 : i32
    return %arg0, %c0_i32, %c0_i32_0 : i32, i32, i32
  }
}

module attributes {stable_mosaic.version = 11 : i64} {
  func.func @bert_encoder_kernel(%arg0: i32, %arg1: i32, %arg2: memref<1x8x128xf32, #tpu.memory_space<vmem>>, %arg3: memref<1x1x8xf32, #tpu.memory_space<vmem>>, %arg4: memref<2x128xf32, #tpu.memory_space<vmem>>, %arg5: memref<1x128x384xbf16, #tpu.memory_space<vmem>>, %arg6: memref<1x128x128xbf16, #tpu.memory_space<vmem>>, %arg7: memref<1x128x256xbf16, #tpu.memory_space<vmem>>, %arg8: memref<1x256x128xbf16, #tpu.memory_space<vmem>>, %arg9: memref<1x8x384xf32, #tpu.memory_space<vmem>>, %arg10: memref<1x8x128xf32, #tpu.memory_space<vmem>>, %arg11: memref<8x128xf32, #tpu.memory_space<vmem>>) attributes {dimension_semantics = [#tpu.dimension_semantics<parallel>, #tpu.dimension_semantics<arbitrary>], iteration_bounds = array<i64: 2, 2>, scalar_prefetch = 0 : i64, scratch_operands = 1 : i64, tpu.core_type = #tpu.core_type<tc>, window_params = [{transform_indices = @transform_0, window_bounds = array<i64: 1, 8, 128>}, {transform_indices = @transform_1, window_bounds = array<i64: 1, 1, 8>}, {pipeline_mode = #tpu.pipeline_mode<synchronous>, transform_indices = @transform_2, window_bounds = array<i64: 2, 128>}, {transform_indices = @transform_3, window_bounds = array<i64: 1, 128, 384>}, {transform_indices = @transform_4, window_bounds = array<i64: 1, 128, 128>}, {transform_indices = @transform_5, window_bounds = array<i64: 1, 128, 256>}, {transform_indices = @transform_6, window_bounds = array<i64: 1, 256, 128>}, {transform_indices = @transform_7, window_bounds = array<i64: 1, 8, 384>}, {transform_indices = @transform_8, window_bounds = array<i64: 1, 8, 128>}]} {
    %c0_i32 = arith.constant 0 : i32
    %0 = arith.cmpi eq, %arg1, %c0_i32 : i32
    %1 = arith.extui %0 : i1 to i32
    %c0_i32_0 = arith.constant 0 : i32
    %2 = arith.cmpi ne, %1, %c0_i32_0 : i32
    scf.if %2 {
      %c0_50 = arith.constant 0 : index
      %c0_51 = arith.constant 0 : index
      %c0_52 = arith.constant 0 : index
      %143 = vector.load %arg2[%c0_50, %c0_51, %c0_52] : memref<1x8x128xf32, #tpu.memory_space<vmem>>, vector<1x8x128xf32>
      %144 = vector.shape_cast %143 : vector<1x8x128xf32> to vector<8x128xf32>
      %c0_53 = arith.constant 0 : index
      %c0_54 = arith.constant 0 : index
      %145 = vector.load %arg4[%c0_53, %c0_54] : memref<2x128xf32, #tpu.memory_space<vmem>>, vector<1x128xf32>
      %c1 = arith.constant 1 : index
      %c0_55 = arith.constant 0 : index
      %146 = vector.load %arg4[%c1, %c0_55] : memref<2x128xf32, #tpu.memory_space<vmem>>, vector<1x128xf32>
      %cst_56 = arith.constant dense<0.000000e+00> : vector<8xf32>
      %147 = vector.multi_reduction <add>, %144, %cst_56 [1] : vector<8x128xf32> to vector<8xf32>
      %148 = vector.shape_cast %147 : vector<8xf32> to vector<8x1xf32>
      %cst_57 = arith.constant 1.280000e+02 : f32
      %149 = vector.broadcast %cst_57 : f32 to vector<8x1xf32>
      %150 = arith.divf %148, %149 : vector<8x1xf32>
      %151 = vector.broadcast %150 : vector<8x1xf32> to vector<8x128xf32>
      %152 = arith.subf %144, %151 : vector<8x128xf32>
      %153 = arith.mulf %152, %152 : vector<8x128xf32>
      %cst_58 = arith.constant dense<0.000000e+00> : vector<8xf32>
      %154 = vector.multi_reduction <add>, %153, %cst_58 [1] : vector<8x128xf32> to vector<8xf32>
      %155 = vector.shape_cast %154 : vector<8xf32> to vector<8x1xf32>
      %cst_59 = arith.constant 1.280000e+02 : f32
      %156 = vector.broadcast %cst_59 : f32 to vector<8x1xf32>
      %157 = arith.divf %155, %156 : vector<8x1xf32>
      %158 = vector.broadcast %150 : vector<8x1xf32> to vector<8x128xf32>
      %159 = arith.subf %144, %158 : vector<8x128xf32>
      %cst_60 = arith.constant 9.99999996E-13 : f32
      %160 = vector.broadcast %cst_60 : f32 to vector<8x1xf32>
      %161 = arith.addf %157, %160 : vector<8x1xf32>
      %162 = math.rsqrt %161 : vector<8x1xf32>
      %163 = vector.broadcast %162 : vector<8x1xf32> to vector<8x128xf32>
      %164 = arith.mulf %159, %163 : vector<8x128xf32>
      %165 = vector.broadcast %145 : vector<1x128xf32> to vector<8x128xf32>
      %166 = arith.mulf %164, %165 : vector<8x128xf32>
      %167 = vector.broadcast %146 : vector<1x128xf32> to vector<8x128xf32>
      %168 = arith.addf %166, %167 : vector<8x128xf32>
      %c0_61 = arith.constant 0 : index
      %c0_62 = arith.constant 0 : index
      %169 = vector.load %arg11[%c0_61, %c0_62] : memref<8x128xf32, #tpu.memory_space<vmem>>, vector<8x128xf32>
      tpu.vector_store %arg11[%c0_61, %c0_62], %168 {strides = array<i32>} : memref<8x128xf32, #tpu.memory_space<vmem>>, vector<8x128xf32>,
    } else {
    }
    %c0 = arith.constant 0 : index
    %c0_1 = arith.constant 0 : index
    %3 = vector.load %arg11[%c0, %c0_1] : memref<8x128xf32, #tpu.memory_space<vmem>>, vector<8x128xf32>
    %4 = arith.truncf %3 : vector<8x128xf32> to vector<8x128xbf16>
    %c0_2 = arith.constant 0 : index
    %c0_3 = arith.constant 0 : index
    %c0_4 = arith.constant 0 : index
    %5 = vector.load %arg9[%c0_2, %c0_3, %c0_4] : memref<1x8x384xf32, #tpu.memory_space<vmem>>, vector<1x8x384xf32>
    %6 = vector.shape_cast %5 : vector<1x8x384xf32> to vector<8x384xf32>
    %c0_5 = arith.constant 0 : index
    %c0_6 = arith.constant 0 : index
    %c0_7 = arith.constant 0 : index
    %7 = vector.load %arg5[%c0_5, %c0_6, %c0_7] : memref<1x128x384xbf16, #tpu.memory_space<vmem>>, vector<1x128x384xbf16>
    %8 = vector.shape_cast %7 : vector<1x128x384xbf16> to vector<128x384xbf16>
    %cst = arith.constant dense<0.000000e+00> : vector<8x384xf32>
    %9 = tpu.matmul %4, %8, %cst {dimension_numbers = #tpu.dot_dimension_numbers<[1], [0], [0], [1], [0, 0, 1, 1], [], []>} : vector<8x128xbf16>, vector<128x384xbf16>, vector<8x384xf32> -> vector<8x384xf32>
    %10 = vector.extract_strided_slice %6 {offsets = [0, 0], sizes = [1, 384], strides = [1, 1]} : vector<8x384xf32> to vector<1x384xf32>
    %11 = vector.broadcast %10 : vector<1x384xf32> to vector<8x384xf32>
    %12 = arith.addf %9, %11 : vector<8x384xf32>
    %13 = arith.truncf %12 : vector<8x384xf32> to vector<8x384xbf16>
    %c0_8 = arith.constant 0 : index
    %c0_9 = arith.constant 0 : index
    %c0_10 = arith.constant 0 : index
    %14 = vector.load %arg3[%c0_8, %c0_9, %c0_10] : memref<1x1x8xf32, #tpu.memory_space<vmem>>, vector<1x1x8xf32>
    %15 = vector.shape_cast %14 : vector<1x1x8xf32> to vector<1x8xf32>
    %16 = vector.extract_strided_slice %13 {offsets = [0, 0], sizes = [8, 64], strides = [1, 1]} : vector<8x384xbf16> to vector<8x64xbf16>
    %17 = vector.extract_strided_slice %13 {offsets = [0, 128], sizes = [8, 64], strides = [1, 1]} : vector<8x384xbf16> to vector<8x64xbf16>
    %18 = vector.extract_strided_slice %13 {offsets = [0, 256], sizes = [8, 64], strides = [1, 1]} : vector<8x384xbf16> to vector<8x64xbf16>
    %cst_11 = arith.constant dense<0.000000e+00> : vector<8x8xf32>
    %19 = tpu.matmul %16, %17, %cst_11 {dimension_numbers = #tpu.dot_dimension_numbers<[1], [1], [0], [0], [0, 0, 1, 0], [], []>} : vector<8x64xbf16>, vector<8x64xbf16>, vector<8x8xf32> -> vector<8x8xf32>
    %cst_12 = arith.constant 1.250000e-01 : f32
    %20 = vector.broadcast %cst_12 : f32 to vector<8x8xf32>
    %21 = arith.mulf %19, %20 : vector<8x8xf32>
    %22 = vector.broadcast %15 : vector<1x8xf32> to vector<8x8xf32>
    %23 = arith.addf %21, %22 : vector<8x8xf32>
    %cst_13 = arith.constant dense<0xFF800000> : vector<8xf32>
    %24 = vector.multi_reduction <maximumf>, %23, %cst_13 [1] : vector<8x8xf32> to vector<8xf32>
    %25 = vector.shape_cast %24 : vector<8xf32> to vector<8x1xf32>
    %26 = vector.broadcast %25 : vector<8x1xf32> to vector<8x8xf32>
    %27 = arith.subf %23, %26 : vector<8x8xf32>
    %28 = math.exp %27 : vector<8x8xf32>
    %cst_14 = arith.constant dense<0.000000e+00> : vector<8xf32>
    %29 = vector.multi_reduction <add>, %28, %cst_14 [1] : vector<8x8xf32> to vector<8xf32>
    %30 = vector.shape_cast %29 : vector<8xf32> to vector<8x1xf32>
    %31 = vector.broadcast %30 : vector<8x1xf32> to vector<8x8xf32>
    %32 = arith.divf %28, %31 : vector<8x8xf32>
    %33 = arith.truncf %32 : vector<8x8xf32> to vector<8x8xbf16>
    %cst_15 = arith.constant dense<0.000000e+00> : vector<8x64xf32>
    %34 = tpu.matmul %33, %18, %cst_15 {dimension_numbers = #tpu.dot_dimension_numbers<[1], [0], [0], [1], [0, 0, 1, 1], [], []>} : vector<8x8xbf16>, vector<8x64xbf16>, vector<8x64xf32> -> vector<8x64xf32>
    %35 = vector.extract_strided_slice %13 {offsets = [0, 64], sizes = [8, 64], strides = [1, 1]} : vector<8x384xbf16> to vector<8x64xbf16>
    %36 = vector.extract_strided_slice %13 {offsets = [0, 192], sizes = [8, 64], strides = [1, 1]} : vector<8x384xbf16> to vector<8x64xbf16>
    %37 = vector.extract_strided_slice %13 {offsets = [0, 320], sizes = [8, 64], strides = [1, 1]} : vector<8x384xbf16> to vector<8x64xbf16>
    %cst_16 = arith.constant dense<0.000000e+00> : vector<8x8xf32>
    %38 = tpu.matmul %35, %36, %cst_16 {dimension_numbers = #tpu.dot_dimension_numbers<[1], [1], [0], [0], [0, 0, 1, 0], [], []>} : vector<8x64xbf16>, vector<8x64xbf16>, vector<8x8xf32> -> vector<8x8xf32>
    %cst_17 = arith.constant 1.250000e-01 : f32
    %39 = vector.broadcast %cst_17 : f32 to vector<8x8xf32>
    %40 = arith.mulf %38, %39 : vector<8x8xf32>
    %41 = vector.broadcast %15 : vector<1x8xf32> to vector<8x8xf32>
    %42 = arith.addf %40, %41 : vector<8x8xf32>
    %cst_18 = arith.constant dense<0xFF800000> : vector<8xf32>
    %43 = vector.multi_reduction <maximumf>, %42, %cst_18 [1] : vector<8x8xf32> to vector<8xf32>
    %44 = vector.shape_cast %43 : vector<8xf32> to vector<8x1xf32>
    %45 = vector.broadcast %44 : vector<8x1xf32> to vector<8x8xf32>
    %46 = arith.subf %42, %45 : vector<8x8xf32>
    %47 = math.exp %46 : vector<8x8xf32>
    %cst_19 = arith.constant dense<0.000000e+00> : vector<8xf32>
    %48 = vector.multi_reduction <add>, %47, %cst_19 [1] : vector<8x8xf32> to vector<8xf32>
    %49 = vector.shape_cast %48 : vector<8xf32> to vector<8x1xf32>
    %50 = vector.broadcast %49 : vector<8x1xf32> to vector<8x8xf32>
    %51 = arith.divf %47, %50 : vector<8x8xf32>
    %52 = arith.truncf %51 : vector<8x8xf32> to vector<8x8xbf16>
    %cst_20 = arith.constant dense<0.000000e+00> : vector<8x64xf32>
    %53 = tpu.matmul %52, %37, %cst_20 {dimension_numbers = #tpu.dot_dimension_numbers<[1], [0], [0], [1], [0, 0, 1, 1], [], []>} : vector<8x8xbf16>, vector<8x64xbf16>, vector<8x64xf32> -> vector<8x64xf32>
    %54 = tpu.concatenate %34, %53 in 1 : vector<8x64xf32>, vector<8x64xf32> -> vector<8x128xf32>
    %55 = arith.truncf %54 : vector<8x128xf32> to vector<8x128xbf16>
    %c0_21 = arith.constant 0 : index
    %c0_22 = arith.constant 0 : index
    %c0_23 = arith.constant 0 : index
    %56 = vector.load %arg6[%c0_21, %c0_22, %c0_23] : memref<1x128x128xbf16, #tpu.memory_space<vmem>>, vector<1x128x128xbf16>
    %57 = vector.shape_cast %56 : vector<1x128x128xbf16> to vector<128x128xbf16>
    %cst_24 = arith.constant dense<0.000000e+00> : vector<8x128xf32>
    %58 = tpu.matmul %55, %57, %cst_24 {dimension_numbers = #tpu.dot_dimension_numbers<[1], [0], [0], [1], [0, 0, 1, 1], [], []>} : vector<8x128xbf16>, vector<128x128xbf16>, vector<8x128xf32> -> vector<8x128xf32>
    %59 = vector.extract_strided_slice %6 {offsets = [1, 0], sizes = [1, 128], strides = [1, 1]} : vector<8x384xf32> to vector<1x128xf32>
    %60 = vector.broadcast %59 : vector<1x128xf32> to vector<8x128xf32>
    %61 = arith.addf %58, %60 : vector<8x128xf32>
    %62 = arith.addf %3, %61 : vector<8x128xf32>
    %63 = vector.extract_strided_slice %6 {offsets = [4, 0], sizes = [1, 128], strides = [1, 1]} : vector<8x384xf32> to vector<1x128xf32>
    %64 = vector.extract_strided_slice %6 {offsets = [5, 0], sizes = [1, 128], strides = [1, 1]} : vector<8x384xf32> to vector<1x128xf32>
    %cst_25 = arith.constant dense<0.000000e+00> : vector<8xf32>
    %65 = vector.multi_reduction <add>, %62, %cst_25 [1] : vector<8x128xf32> to vector<8xf32>
    %66 = vector.shape_cast %65 : vector<8xf32> to vector<8x1xf32>
    %cst_26 = arith.constant 1.280000e+02 : f32
    %67 = vector.broadcast %cst_26 : f32 to vector<8x1xf32>
    %68 = arith.divf %66, %67 : vector<8x1xf32>
    %69 = vector.broadcast %68 : vector<8x1xf32> to vector<8x128xf32>
    %70 = arith.subf %62, %69 : vector<8x128xf32>
    %71 = arith.mulf %70, %70 : vector<8x128xf32>
    %cst_27 = arith.constant dense<0.000000e+00> : vector<8xf32>
    %72 = vector.multi_reduction <add>, %71, %cst_27 [1] : vector<8x128xf32> to vector<8xf32>
    %73 = vector.shape_cast %72 : vector<8xf32> to vector<8x1xf32>
    %cst_28 = arith.constant 1.280000e+02 : f32
    %74 = vector.broadcast %cst_28 : f32 to vector<8x1xf32>
    %75 = arith.divf %73, %74 : vector<8x1xf32>
    %76 = vector.broadcast %68 : vector<8x1xf32> to vector<8x128xf32>
    %77 = arith.subf %62, %76 : vector<8x128xf32>
    %cst_29 = arith.constant 9.99999996E-13 : f32
    %78 = vector.broadcast %cst_29 : f32 to vector<8x1xf32>
    %79 = arith.addf %75, %78 : vector<8x1xf32>
    %80 = math.rsqrt %79 : vector<8x1xf32>
    %81 = vector.broadcast %80 : vector<8x1xf32> to vector<8x128xf32>
    %82 = arith.mulf %77, %81 : vector<8x128xf32>
    %83 = vector.broadcast %63 : vector<1x128xf32> to vector<8x128xf32>
    %84 = arith.mulf %82, %83 : vector<8x128xf32>
    %85 = vector.broadcast %64 : vector<1x128xf32> to vector<8x128xf32>
    %86 = arith.addf %84, %85 : vector<8x128xf32>
    %87 = arith.truncf %86 : vector<8x128xf32> to vector<8x128xbf16>
    %c0_30 = arith.constant 0 : index
    %c0_31 = arith.constant 0 : index
    %c0_32 = arith.constant 0 : index
    %88 = vector.load %arg7[%c0_30, %c0_31, %c0_32] : memref<1x128x256xbf16, #tpu.memory_space<vmem>>, vector<1x128x256xbf16>
    %89 = vector.shape_cast %88 : vector<1x128x256xbf16> to vector<128x256xbf16>
    %cst_33 = arith.constant dense<0.000000e+00> : vector<8x256xf32>
    %90 = tpu.matmul %87, %89, %cst_33 {dimension_numbers = #tpu.dot_dimension_numbers<[1], [0], [0], [1], [0, 0, 1, 1], [], []>} : vector<8x128xbf16>, vector<128x256xbf16>, vector<8x256xf32> -> vector<8x256xf32>
    %91 = vector.extract_strided_slice %6 {offsets = [2, 0], sizes = [1, 256], strides = [1, 1]} : vector<8x384xf32> to vector<1x256xf32>
    %92 = vector.broadcast %91 : vector<1x256xf32> to vector<8x256xf32>
    %93 = arith.addf %90, %92 : vector<8x256xf32>
    %94 = arith.mulf %93, %93 : vector<8x256xf32>
    %95 = arith.mulf %93, %94 : vector<8x256xf32>
    %cst_34 = arith.constant 4.471500e-02 : f32
    %96 = vector.broadcast %cst_34 : f32 to vector<8x256xf32>
    %97 = arith.mulf %96, %95 : vector<8x256xf32>
    %98 = arith.addf %93, %97 : vector<8x256xf32>
    %cst_35 = arith.constant 0.797884583 : f32
    %99 = vector.broadcast %cst_35 : f32 to vector<8x256xf32>
    %100 = arith.mulf %99, %98 : vector<8x256xf32>
    %101 = math.tanh %100 : vector<8x256xf32>
    %cst_36 = arith.constant 1.000000e+00 : f32
    %102 = vector.broadcast %cst_36 : f32 to vector<8x256xf32>
    %103 = arith.addf %102, %101 : vector<8x256xf32>
    %cst_37 = arith.constant 5.000000e-01 : f32
    %104 = vector.broadcast %cst_37 : f32 to vector<8x256xf32>
    %105 = arith.mulf %104, %103 : vector<8x256xf32>
    %106 = arith.mulf %93, %105 : vector<8x256xf32>
    %107 = arith.truncf %106 : vector<8x256xf32> to vector<8x256xbf16>
    %c0_38 = arith.constant 0 : index
    %c0_39 = arith.constant 0 : index
    %c0_40 = arith.constant 0 : index
    %108 = vector.load %arg8[%c0_38, %c0_39, %c0_40] : memref<1x256x128xbf16, #tpu.memory_space<vmem>>, vector<1x256x128xbf16>
    %109 = vector.shape_cast %108 : vector<1x256x128xbf16> to vector<256x128xbf16>
    %cst_41 = arith.constant dense<0.000000e+00> : vector<8x128xf32>
    %110 = tpu.matmul %107, %109, %cst_41 {dimension_numbers = #tpu.dot_dimension_numbers<[1], [0], [0], [1], [0, 0, 1, 1], [], []>} : vector<8x256xbf16>, vector<256x128xbf16>, vector<8x128xf32> -> vector<8x128xf32>
    %111 = vector.extract_strided_slice %6 {offsets = [3, 0], sizes = [1, 128], strides = [1, 1]} : vector<8x384xf32> to vector<1x128xf32>
    %112 = vector.broadcast %111 : vector<1x128xf32> to vector<8x128xf32>
    %113 = arith.addf %110, %112 : vector<8x128xf32>
    %114 = arith.addf %86, %113 : vector<8x128xf32>
    %115 = vector.extract_strided_slice %6 {offsets = [6, 0], sizes = [1, 128], strides = [1, 1]} : vector<8x384xf32> to vector<1x128xf32>
    %116 = vector.extract_strided_slice %6 {offsets = [7, 0], sizes = [1, 128], strides = [1, 1]} : vector<8x384xf32> to vector<1x128xf32>
    %cst_42 = arith.constant dense<0.000000e+00> : vector<8xf32>
    %117 = vector.multi_reduction <add>, %114, %cst_42 [1] : vector<8x128xf32> to vector<8xf32>
    %118 = vector.shape_cast %117 : vector<8xf32> to vector<8x1xf32>
    %cst_43 = arith.constant 1.280000e+02 : f32
    %119 = vector.broadcast %cst_43 : f32 to vector<8x1xf32>
    %120 = arith.divf %118, %119 : vector<8x1xf32>
    %121 = vector.broadcast %120 : vector<8x1xf32> to vector<8x128xf32>
    %122 = arith.subf %114, %121 : vector<8x128xf32>
    %123 = arith.mulf %122, %122 : vector<8x128xf32>
    %cst_44 = arith.constant dense<0.000000e+00> : vector<8xf32>
    %124 = vector.multi_reduction <add>, %123, %cst_44 [1] : vector<8x128xf32> to vector<8xf32>
    %125 = vector.shape_cast %124 : vector<8xf32> to vector<8x1xf32>
    %cst_45 = arith.constant 1.280000e+02 : f32
    %126 = vector.broadcast %cst_45 : f32 to vector<8x1xf32>
    %127 = arith.divf %125, %126 : vector<8x1xf32>
    %128 = vector.broadcast %120 : vector<8x1xf32> to vector<8x128xf32>
    %129 = arith.subf %114, %128 : vector<8x128xf32>
    %cst_46 = arith.constant 9.99999996E-13 : f32
    %130 = vector.broadcast %cst_46 : f32 to vector<8x1xf32>
    %131 = arith.addf %127, %130 : vector<8x1xf32>
    %132 = math.rsqrt %131 : vector<8x1xf32>
    %133 = vector.broadcast %132 : vector<8x1xf32> to vector<8x128xf32>
    %134 = arith.mulf %129, %133 : vector<8x128xf32>
    %135 = vector.broadcast %115 : vector<1x128xf32> to vector<8x128xf32>
    %136 = arith.mulf %134, %135 : vector<8x128xf32>
    %137 = vector.broadcast %116 : vector<1x128xf32> to vector<8x128xf32>
    %138 = arith.addf %136, %137 : vector<8x128xf32>
    %c0_47 = arith.constant 0 : index
    %c0_48 = arith.constant 0 : index
    %139 = vector.load %arg11[%c0_47, %c0_48] : memref<8x128xf32, #tpu.memory_space<vmem>>, vector<8x128xf32>
    tpu.vector_store %arg11[%c0_47, %c0_48], %138 {strides = array<i32>} : memref<8x128xf32, #tpu.memory_space<vmem>>, vector<8x128xf32>,
    %c1_i32 = arith.constant 1 : i32
    %140 = arith.cmpi eq, %arg1, %c1_i32 : i32
    %141 = arith.extui %140 : i1 to i32
    %c0_i32_49 = arith.constant 0 : i32
    %142 = arith.cmpi ne, %141, %c0_i32_49 : i32
    scf.if %142 {
      %c0_50 = arith.constant 0 : index
      %c0_51 = arith.constant 0 : index
      %c0_52 = arith.constant 0 : index
      %143 = vector.load %arg10[%c0_50, %c0_51, %c0_52] : memref<1x8x128xf32, #tpu.memory_space<vmem>>, vector<1x8x128xf32>
      %144 = vector.shape_cast %143 : vector<1x8x128xf32> to vector<8x128xf32>
      %145 = vector.shape_cast %138 : vector<8x128xf32> to vector<1x8x128xf32>
      tpu.vector_store %arg10[%c0_50, %c0_51, %c0_52], %145 {strides = array<i32>} : memref<1x8x128xf32, #tpu.memory_space<vmem>>, vector<1x8x128xf32>,
    } else {
    }
    return
  }
  func.func @transform_0(%arg0: i32, %arg1: i32) -> (i32, i32, i32) {
    %c0_i32 = arith.constant 0 : i32
    %c0_i32_0 = arith.constant 0 : i32
    %c0_i32_1 = arith.constant 0 : i32
    return %arg0, %c0_i32, %c0_i32_0 : i32, i32, i32
  }
  func.func @transform_1(%arg0: i32, %arg1: i32) -> (i32, i32, i32) {
    %c0_i32 = arith.constant 0 : i32
    %c0_i32_0 = arith.constant 0 : i32
    %c0_i32_1 = arith.constant 0 : i32
    return %arg0, %c0_i32, %c0_i32_0 : i32, i32, i32
  }
  func.func @transform_2(%arg0: i32, %arg1: i32) -> (i32, i32) {
    %c0_i32 = arith.constant 0 : i32
    %c0_i32_0 = arith.constant 0 : i32
    %c0_i32_1 = arith.constant 0 : i32
    return %c0_i32, %c0_i32_0 : i32, i32
  }
  func.func @transform_3(%arg0: i32, %arg1: i32) -> (i32, i32, i32) {
    %c0_i32 = arith.constant 0 : i32
    %c0_i32_0 = arith.constant 0 : i32
    %c0_i32_1 = arith.constant 0 : i32
    return %arg1, %c0_i32, %c0_i32_0 : i32, i32, i32
  }
  func.func @transform_4(%arg0: i32, %arg1: i32) -> (i32, i32, i32) {
    %c0_i32 = arith.constant 0 : i32
    %c0_i32_0 = arith.constant 0 : i32
    %c0_i32_1 = arith.constant 0 : i32
    return %arg1, %c0_i32, %c0_i32_0 : i32, i32, i32
  }
  func.func @transform_5(%arg0: i32, %arg1: i32) -> (i32, i32, i32) {
    %c0_i32 = arith.constant 0 : i32
    %c0_i32_0 = arith.constant 0 : i32
    %c0_i32_1 = arith.constant 0 : i32
    return %arg1, %c0_i32, %c0_i32_0 : i32, i32, i32
  }
  func.func @transform_6(%arg0: i32, %arg1: i32) -> (i32, i32, i32) {
    %c0_i32 = arith.constant 0 : i32
    %c0_i32_0 = arith.constant 0 : i32
    %c0_i32_1 = arith.constant 0 : i32
    return %arg1, %c0_i32, %c0_i32_0 : i32, i32, i32
  }
  func.func @transform_7(%arg0: i32, %arg1: i32) -> (i32, i32, i32) {
    %c0_i32 = arith.constant 0 : i32
    %c0_i32_0 = arith.constant 0 : i32
    %c0_i32_1 = arith.constant 0 : i32
    return %arg1, %c0_i32, %c0_i32_0 : i32, i32, i32
  }
  func.func @transform_8(%arg0: i32, %arg1: i32) -> (i32, i32, i32) {
    %c0_i32 = arith.constant 0 : i32
    %c0_i32_0 = arith.constant 0 : i32
    %c0_i32_1 = arith.constant 0 : i32
    return %arg0, %c0_i32, %c0_i32_0 : i32, i32, i32
  }
}

</mosaic_0001>

<bundles_post_ra>
// kernel: _forward.3
= control target key start
LH: loop header
LB: loop body
LE: loop exit
PB: predicated region body
PF: predicated region fallthrough
CT: control target
= control target key end

     0   :  { %13 = vsyncpa [#allocation3], 0  ;;  %s2044_s0 = inlined_call_operand.vmem [shape: f32[2,8,128], index: 0, kind: input, shape index: {}]   ;;  %s2045_s1 = inlined_call_operand.vmem [shape: f32[2,8,1], index: 1, kind: input, shape index: {}]   ;;  %s2046_s2 = inlined_call_operand.vmem [shape: f32[2,1,128], index: 2, kind: input, shape index: {}]   ;;  %s2047_s3 = inlined_call_operand.vmem [shape: bf16[6,128,128], index: 3, kind: input, shape index: {}]   ;;  %s2048_s4 = inlined_call_operand.vmem [shape: f32[8,128], index: 4, kind: input, shape index: {}]   ;;  %s2049_s5 = inlined_call_operand.vmem [shape: bf16[128,4], index: 5, kind: input, shape index: {}]   ;;  %s2050_s6 = inlined_call_operand.hbm [shape: f32[2,1,128], index: 6, kind: output, shape index: {0}]   ;;  %s2051_s7 = inlined_call_operand.hbm [shape: f32[2,1,4], index: 7, kind: output, shape index: {1}]  }
   0x1   :  { %15 = vsyncpa [#allocation3 + $0x1], 0 }
   0x2   :  { %16 = vsyncpa [#allocation5], 0 }
   0x3   :  { %18 = vsyncpa [#allocation5 + $0x1], 0  ;;  %s1684_s24 = smov 0   ;;  %s1686_s25 = smov 0  }
   0x4   :  { %s1688_s26 = smov 0   ;;  %s1690_s27 = smov 0  }
   0x5 LB: > { %s1705_s28 = sadd.s32 4294967295, %s1637_s27   ;;  %s1133_s29 = sadd.s32 4294967294, %s1637_s27   ;;  %s1637_s27 = sphi %s1690_s27, %s2057_s27   ;;  %s1633_s26 = sphi %s1688_s26, %s2056_s26   ;;  %s1629_s25 = sphi %s1686_s25, %s2055_s25   ;;  %s1625_s24 = sphi %s1684_s24, %s2054_s24  }
   0x6   : > { %s1709_s30 = sadd.s32 1, %s1637_s27   ;;  %s172_s8 = sadd.s32 1, %s1633_s26 }
   0x7   : > { %s169_s9 = ssub.s32 %s1637_s27, %s1709_s30  ;;  %p182_p0 = scmp.ne.s32.totalorder %s1633_s26, %s1629_s25 }
   0x8   : > { %p170_p1 = scmp.eq.s32.totalorder %s169_s9, 0  ;;  %p183_p2 = scmp.eq.s32.totalorder %s1705_s28, 1 }
   0x9   : > { %p188_p3 = scmp.ne.s32.totalorder %s1629_s25, %s1625_s24  ;;  %p189_p4 = scmp.eq.s32.totalorder %s1133_s29, 1 }
   0xa   : > { %s1720_s10 = scalar_select %p170_p1, %s1633_s26, %s172_s8  }
   0xb   : > { %p1722_p5 = por %p183_p2, %p182_p0  ;;  %p1726_p6 = por %p189_p4, %p188_p3 }
   0xc   : > { %p1136_p7 = scmp.ge.s32.totalorder %s1637_s27, 1  ;;  %p262_p8 = scmp.lt.s32.totalorder %s1637_s27, 3 }
   0xe   : > { %p263_p9 = pnand %p1136_p7, %p262_p8 }
   0xf   : > { %p303_p10 = scmp.lt.s32.totalorder (!%p263_p9), %s1705_s28, 1  ;;  %v1639_v0 = vmov (!%p263_p9), 0   ;;  %v1640_v1 = vmov (!%p263_p9), 0.0   ;;  %v1493_v2 = vld [vmem:[%s2047_s3 + $0x80] sm:$0xff] (!%p263_p9)   ;;  %vm318_vm0 = vcmask (!%p263_p9), 7168   ;;  %v1495_v4 = vld [vmem:[%s2047_s3 + $0x88] sm:$0xff] (!%p263_p9)  }
  0x10   : > { %266 = sbr.rel (%p263_p9) target bundleno = 1068 (0x42c), region = 44  ;;  %1492 = vset.pattern.permute.xlu0 (!%p263_p9), %v1639_v0  ;;  %1345 = vmatprep.subr.bf16.mxu1 (!%p263_p9), %v1640_v1  ;;  %v1494_v3 = vld [vmem:[%s2047_s3 + $0x40] sm:$0xff] (!%p263_p9)   ;;  %v1496_v5 = vld [vmem:[%s2047_s3 + $0x48] sm:$0xff] (!%p263_p9)   ;;  %v1497_v8 = vld [vmem:[%s2047_s3 + $0x90] sm:$0xff] (!%p263_p9)   ;;  %vm1641_vm1 = vmmov (!%p263_p9), 0   ;;  %s1965_s17 = sand.u32 (!%p263_p9), 1, %s1629_s25  }
  0x11   : > { %1325 = vmatprep.subr.bf16.mxu0 (!%p263_p9), %v1640_v1  ;;  %1346 = vmatpush3.bf16.msra.mxu1 (!%p263_p9), %v1493_v2  ;;  %v1498_v12 = vld [vmem:[%s2047_s3 + $0x50] sm:$0xff] (!%p263_p9)   ;;  %v1499_v13 = vld [vmem:[%s2047_s3 + $0x98] sm:$0xff] (!%p263_p9)   ;;  %v1501_v17 = vld [vmem:[%s2047_s3 + $0xa0] sm:$0xff] (!%p263_p9)   ;;  %s296_s18 = scalar_lea.vmem (!%p263_p9), [#allocation2], %s1965_s17 }
  0x12   : > { %1326 = vmatpush3.bf16.msra.mxu0 (!%p263_p9), %v1494_v3  ;;  %1347 = vmatprep.subr.bf16.mxu1 (!%p263_p9), %v1640_v1  ;;  %v1500_v16 = vld [vmem:[%s2047_s3 + $0x58] sm:$0xff] (!%p263_p9)   ;;  %v1502_v20 = vld [vmem:[%s2047_s3 + $0x60] sm:$0xff] (!%p263_p9)   ;;  %v1503_v21 = vld [vmem:[%s2047_s3 + $0xa8] sm:$0xff] (!%p263_p9)  }
  0x13   : > { %1327 = vmatprep.subr.bf16.mxu0 (!%p263_p9), %v1640_v1  ;;  %v1504_v22 = vld [vmem:[%s2047_s3 + $0x68] sm:$0xff] (!%p263_p9)   ;;  %v1505_v23 = vld [vmem:[%s2047_s3 + $0xb0] sm:$0xff] (!%p263_p9)   ;;  %1361 = vmatprep.mubr.msk.bf16.mxu1 (!%p263_p9), %vm1641_vm1, %v1640_v1  ;;  %v1507_v25 = vld [vmem:[%s2047_s3 + $0xb8] sm:$0xff] (!%p263_p9)  }
  0x14   : > { %v1506_v24 = vld [vmem:[%s2047_s3 + $0x70] sm:$0xff] (!%p263_p9)   ;;  %1341 = vmatprep.mubr.msk.bf16.mxu0 (!%p263_p9), %vm1641_vm1, %v1640_v1  ;;  %v1508_v27 = vld [vmem:[%s2047_s3 + $0x78] sm:$0xff] (!%p263_p9)   ;;  %v1510_v29 = vld [vmem:[%s2047_s3 + $0xc0] sm:$0xff] (!%p263_p9)  }
  0x15   : > { %1348 = vmatpush3.bf16.msra.mxu1 (!%p263_p9), %v1495_v4  ;;  %v1512_v30 = vld [vmem:[%s2047_s3 + $0xc8] sm:$0xff] (!%p263_p9)   ;;  %v1514_v31 = vld [vmem:[%s2047_s3 + $0xd0] sm:$0xff] (!%p263_p9)   ;;  %v1516_v32 = vld [vmem:[%s2047_s3 + $0xd8] sm:$0xff] (!%p263_p9)  }
  0x16   : > { %1328 = vmatpush3.bf16.msra.mxu0 (!%p263_p9), %v1496_v5  ;;  %1349 = vmatprep.subr.bf16.mxu1 (!%p263_p9), %v1640_v1  ;;  %v1518_v33 = vld [vmem:[%s2047_s3 + $0xe0] sm:$0xff] (!%p263_p9)   ;;  %v1520_v34 = vld [vmem:[%s2047_s3 + $0xe8] sm:$0xff] (!%p263_p9)   ;;  %v1522_v35 = vld [vmem:[%s2047_s3 + $0xf0] sm:$0xff] (!%p263_p9)  }
  0x17   : > { %s1738_s15 = scalar_select %p303_p10, %s1705_s28, 1  ;;  %1329 = vmatprep.subr.bf16.mxu0 %v1640_v1  ;;  %v1509_v48 = vld [vmem:[%s2047_s3 + $0x100] sm:$0xff]   ;;  %v1511_v50 = vld [vmem:[%s2047_s3 + $0x108] sm:$0xff]   ;;  %v1513_v51 = vld [vmem:[%s2047_s3 + $0x110] sm:$0xff]  }
  0x18   : > { %v1515_v52 = vld [vmem:[%s2047_s3 + $0x118] sm:$0xff]   ;;  %v1517_v53 = vld [vmem:[%s2047_s3 + $0x120] sm:$0xff]   ;;  %v1519_v54 = vld [vmem:[%s2047_s3 + $0x128] sm:$0xff]  }
  0x19   : > { %s1137_s20 = sshll.u32 %s1738_s15, 3  ;;  %1350 = vmatpush3.bf16.msra.mxu1 %v1497_v8  ;;  %s313_s19 = scalar_lea.vmem %s2046_s2, %s1738_s15  ;;  %v1521_v55 = vld [vmem:[%s2047_s3 + $0x130] sm:$0xff]   ;;  %v1523_v56 = vld [vmem:[%s2047_s3 + $0x138] sm:$0xff]   ;;  %v1888_v57 = vld [vmem:[%s2048_s4] sm:$0xff] }
  0x1a   : > { %s310_s8 = scalar_lea.vmem %s2045_s1, %s1137_s20  ;;  %1351 = vmatprep.subr.bf16.mxu1 %v1640_v1  ;;  %1330 = vmatpush3.bf16.msra.mxu0 %v1498_v12  ;;  %v346_v26 = vld [vmem:[%s313_s19] sm:$0x1]  ;;  %s306_s21 = scalar_lea.vmem %s2044_s0, %s1137_s20  ;;  %v522_v58 = vrot.slane %v1888_v57, 2  ;;  %v1524_v2 = vld [vmem:[%s2047_s3 + $0xf8] sm:$0xff]   ;;  %v1526_v4 = vld [vmem:[%s2047_s3 + $0x148] sm:$0xff]  }
  0x1b   : > { %v316_v6 = vld [vmem:[%s310_s8] sm:$0xff]  ;;  %1331 = vmatprep.subr.bf16.mxu0 %v1640_v1  ;;  %v456_v28 = vpack.c.bf16 %v346_v26, %v346_v26  ;;  %v1527_v5 = vld [vmem:[%s2047_s3 + $0x150] sm:$0xff]   ;;  %v1530_v8 = vld [vmem:[%s2047_s3 + $0x168] sm:$0xff]   ;;  %s1267_s19 = sshll.u32 %s1705_s28, 4  ;;  %s1000_s20 = scalar_lea.sflag [#allocation3], %s1965_s17 }
  0x1c   : > { %329 = vperm.xlu0 %1492, %v316_v6   ;;  %v319_v7 = vsel %vm318_vm0, %v316_v6, 0.0  ;;  %v315_v36 = vld [vmem:[%s306_s21] sm:$0xff]  ;;  %v1528_v6 = vld [vmem:[%s2047_s3 + $0x158] sm:$0xff]   ;;  %s1016_s21 = sshll.u32 %s296_s18, 4  ;;  %s1974_s15 = scalar_lea.hbm %s2050_s6, %s1267_s19  ;;  %s1017_s21 = int_to_ptr.vmem [resolvable:$true] %s1016_s21 }
  0x1d   : > { %v320_v9 = vrot.slane %v319_v7, 4  ;;  %1352 = vmatpush3.bf16.msra.mxu1 %v1499_v13  ;;  %v1525_v3 = vld [vmem:[%s2047_s3 + $0x140] sm:$0xff]   ;;  %s1543_s29 = scalar_lea.vmem %s1017_s21, 16  ;;  %s1642_s8 = smov [#allocation2]  }
  0x1e   : > { %1353 = vmatprep.subr.bf16.mxu1 %v1640_v1  ;;  %1332 = vmatpush3.bf16.msra.mxu0 %v1500_v16  ;;  %v1537_v26 = vld [vmem:[%s2049_s5 + $0x20] sm:$0xff]   ;;  %p1544_p11 = scmp.ne.s32.totalorder %s1017_s21, %s1543_s29  ;;  %s1547_s9 = sshll.u32 %s1642_s8, 4  ;;  %s1548_s9 = int_to_ptr.vmem [resolvable:$false] %s1547_s9 }
  0x1f   : > { %v321_v10 = vadd.f32 %v320_v9, %v319_v7  ;;  %1333 = vmatprep.subr.bf16.mxu0 %v1640_v1  ;;  %v1529_v7 = vld [vmem:[%s2047_s3 + $0x160] sm:$0xff]   ;;  %v414_v9 = vrot.slane %v1888_v57, 1  ;;  %s1549_s13 = scalar_lea.vmem %s1548_s9, 32  ;;  %p1550_p0 = scmp.lt.s32.totalorder %s1017_s21, %s1548_s9 }
  0x20   : > { %p1545_p12 = pnand %p1544_p11, %p1722_p5  ;;  %p1551_p1 = scmp.lt.s32.totalorder %s1549_s13, %s1543_s29 }
  0x21   : > { %v322_v11 = vrot.slane %v321_v10, 2  ;;  %1354 = vmatpush3.bf16.msra.mxu1 %v1501_v17 }
  0x22   : > { %1355 = vmatprep.subr.bf16.mxu1 %v1640_v1  ;;  %1334 = vmatpush3.bf16.msra.mxu0 %v1502_v20  ;;  %v1531_v20 = vld [vmem:[%s2047_s3 + $0x170] sm:$0xff]   ;;  %p1546_p13 = pneg %p1545_p12  ;;  %p1552_p2 = por %p1551_p1, %p1550_p0 }
  0x23   : > { %v323_v14 = vadd.f32 %v322_v11, %v321_v10  ;;  %1335 = vmatprep.subr.bf16.mxu0 %v1640_v1 }
  0x24   : > { %p1553_p3 = pnand %p1552_p2, %p1546_p13 }
  0x25   : > { %v324_v15 = vrot.slane %v323_v14, 1  ;;  %1356 = vmatpush3.bf16.msra.mxu1 %v1503_v21  ;;  %v1532_v21 = vld [vmem:[%s2047_s3 + $0x178] sm:$0xff]  }
  0x26   : > { %1357 = vmatprep.subr.bf16.mxu1 %v1640_v1  ;;  %1336 = vmatpush3.bf16.msra.mxu0 %v1504_v22  ;;  %v1533_v22 = vld [vmem:[%s2049_s5] sm:$0xff]  }
  0x27   : > { %v325_v18 = vadd.f32 %v324_v15, %v323_v14  ;;  %1337 = vmatprep.subr.bf16.mxu0 %v1640_v1 }
  0x29   : > { %v326_v19 = vmax.f32 %v325_v18, 1e-09  ;;  %1358 = vmatpush3.bf16.msra.mxu1 %v1505_v23  ;;  %v1534_v23 = vld [vmem:[%s2049_s5 + $0x8] sm:$0xff]  }
  0x2a   : > { %1359 = vmatprep.subr.bf16.mxu1 %v1640_v1  ;;  %1338 = vmatpush3.bf16.msra.mxu0 %v1506_v24  ;;  %v1535_v24 = vld [vmem:[%s2049_s5 + $0x10] sm:$0xff]  }
  0x2b   : > { %341 = vperm.xlu0 %1492, %v326_v19   ;;  %1339 = vmatprep.subr.bf16.mxu0 %v1640_v1 }
  0x2d   : > { %1360 = vmatpush3.bf16.msra.mxu1 %v1507_v25  ;;  %v1536_v25 = vld [vmem:[%s2049_s5 + $0x18] sm:$0xff]  }
  0x2e   : > { %1385 = vmatprep.subr.bf16.mxu1 %v1640_v1  ;;  %1340 = vmatpush3.bf16.msra.mxu0 %v1508_v27  ;;  %v1538_v27 = vld [vmem:[%s2049_s5 + $0x28] sm:$0xff]  }
  0x2f   : > { %1365 = vmatprep.subr.bf16.mxu0 %v1640_v1 }
  0x30   : > { %1362 = vmatmul.mubr.bf16.vlgmr.msra.gmra.mrb[0].mxu1 %v456_v28  ;;  %v776_v28 = vrot.slane %v1888_v57, 3 }
  0x31   : > { %1401 = vmatprep.mubr.msk.bf16.mxu1 %vm1641_vm1, %v1640_v1  ;;  %1386 = vmatpush3.bf16.msra.mxu1 %v1510_v29 }
  0x32   : > { %1387 = vmatprep.subr.bf16.mxu1 %v1640_v1 }
  0x35   : > { %1388 = vmatpush3.bf16.msra.mxu1 %v1512_v30 }
  0x36   : > { %1389 = vmatprep.subr.bf16.mxu1 %v1640_v1 }
  0x39   : > { %1390 = vmatpush3.bf16.msra.mxu1 %v1514_v31 }
  0x3a   : > { %1391 = vmatprep.subr.bf16.mxu1 %v1640_v1 }
  0x3d   : > { %1392 = vmatpush3.bf16.msra.mxu1 %v1516_v32 }
  0x3e   : > { %1393 = vmatprep.subr.bf16.mxu1 %v1640_v1 }
  0x41   : > { %1394 = vmatpush3.bf16.msra.mxu1 %v1518_v33 }
  0x42   : > { %1395 = vmatprep.subr.bf16.mxu1 %v1640_v1 }
  0x45   : > { %1396 = vmatpush3.bf16.msra.mxu1 %v1520_v34 }
  0x46   : > { %1397 = vmatprep.subr.bf16.mxu1 %v1640_v1 }
  0x49   : > { %1398 = vmatpush3.bf16.msra.mxu1 %v1522_v35 }
  0x4a   : > { %1399 = vmatprep.subr.bf16.mxu1 %v1640_v1 }
  0x4d   : > { %1400 = vmatpush3.bf16.msra.mxu1 %v1524_v2 }
  0x4e   : > { %1425 = vmatprep.subr.bf16.mxu1 %v1640_v1 }
  0x9b   : > { %v330_v37 = vpop.permute.xlu0 %329 }
  0x9c   : > { %v332_v38 = vmul.f32 %v330_v37, %v315_v36  ;;  %v1539_v37 = vld [vmem:[%s2049_s5 + $0x30] sm:$0xff]  }
  0x9e   : > { %v333_v39 = vrot.slane %v332_v38, 4 }
  0xa0   : > { %v334_v40 = vadd.f32 %v333_v39, %v332_v38  ;;  %v1540_v38 = vld [vmem:[%s2049_s5 + $0x38] sm:$0xff]   ;;  %v846_v39 = vrot.slane %v1888_v57, 4 }
  0xa2   : > { %v335_v41 = vrot.slane %v334_v40, 2 }
  0xa4   : > { %v336_v43 = vadd.f32 %v335_v41, %v334_v40 }
  0xa6   : > { %v337_v44 = vrot.slane %v336_v43, 1 }
  0xa8   : > { %v338_v45 = vadd.f32 %v337_v44, %v336_v43 }
  0xaa   : > { %v342_v42 = vpop.permute.xlu0 %341 }
  0xab   : > { %1541 = vrcp.f32 %v342_v42 }
  0xb5   : > { %v1542_v46 = vpop.eup %1541 }
  0xb6   : > { %v345_v47 = vmul.f32 %v1542_v46, %v338_v45 }
  0xb8   : > { %v347_v49 = vpack.c.bf16 %v345_v47, %v345_v47 }
  0xba   : > { %1342 = vmatmul.mubr.bf16.vlgmr.msra.gmra.mrb[0].mxu0 %v347_v49 }
  0xbb   : > { %1366 = vmatpush3.bf16.msra.mxu0 %v1509_v48  ;;  %1381 = vmatprep.mubr.msk.bf16.mxu0 %vm1641_vm1, %v1640_v1 }
  0xbc   : > { %1367 = vmatprep.subr.bf16.mxu0 %v1640_v1 }
  0xbf   : > { %1368 = vmatpush3.bf16.msra.mxu0 %v1511_v50 }
  0xc0   : > { %1369 = vmatprep.subr.bf16.mxu0 %v1640_v1 }
  0xc3   : > { %1370 = vmatpush3.bf16.msra.mxu0 %v1513_v51 }
  0xc4   : > { %1371 = vmatprep.subr.bf16.mxu0 %v1640_v1 }
  0xc7   : > { %1372 = vmatpush3.bf16.msra.mxu0 %v1515_v52 }
  0xc8   : > { %1373 = vmatprep.subr.bf16.mxu0 %v1640_v1 }
  0xcb   : > { %1374 = vmatpush3.bf16.msra.mxu0 %v1517_v53 }
  0xcc   : > { %1375 = vmatprep.subr.bf16.mxu0 %v1640_v1 }
  0xcf   : > { %1376 = vmatpush3.bf16.msra.mxu0 %v1519_v54 }
  0xd0   : > { %1377 = vmatprep.subr.bf16.mxu0 %v1640_v1 }
  0xd3   : > { %1378 = vmatpush3.bf16.msra.mxu0 %v1521_v55 }
  0xd4   : > { %1379 = vmatprep.subr.bf16.mxu0 %v1640_v1 }
  0xd7   : > { %1380 = vmatpush3.bf16.msra.mxu0 %v1523_v56 }
  0xd8   : > { %1405 = vmatprep.subr.bf16.mxu0 %v1640_v1 }
 0x103   : > { %v558_v59 = vpop.f32.mrb[0].mxu1 }
 0x104   : > { %v559_v60 = vadd.f32 %v558_v59, %v522_v58  ;;  %v1363_v61 = vpop.f32.mrb[1].mxu1 }
 0x105   : > { %v561_v62 = vpop.f32.mrb[2].mxu1 }
 0x106   : > { %v582_v63 = vpack.c.bf16 %v559_v60, %v559_v60  ;;  %v1364_v0 = vpop.f32.mrb[3].mxu1 }
 0x108   : > { %1382 = vmatmul.mubr.bf16.vlgmr.msra.gmra.mrb[4].mxu0 %v582_v63 }
 0x109   : > { %1421 = vmatprep.mubr.msk.bf16.mxu0 %vm1641_vm1, %v1640_v1  ;;  %1406 = vmatpush3.bf16.msra.mxu0 %v1525_v3 }
 0x10a   : > { %1407 = vmatprep.subr.bf16.mxu0 %v1640_v1 }
 0x10d   : > { %1408 = vmatpush3.bf16.msra.mxu0 %v1526_v4 }
 0x10e   : > { %1409 = vmatprep.subr.bf16.mxu0 %v1640_v1 }
 0x111   : > { %1410 = vmatpush3.bf16.msra.mxu0 %v1527_v5 }
 0x112   : > { %1411 = vmatprep.subr.bf16.mxu0 %v1640_v1 }
 0x115   : > { %1412 = vmatpush3.bf16.msra.mxu0 %v1528_v6 }
 0x116   : > { %1413 = vmatprep.subr.bf16.mxu0 %v1640_v1 }
 0x119   : > { %1414 = vmatpush3.bf16.msra.mxu0 %v1529_v7 }
 0x11a   : > { %1415 = vmatprep.subr.bf16.mxu0 %v1640_v1 }
 0x11d   : > { %1416 = vmatpush3.bf16.msra.mxu0 %v1530_v8 }
 0x11e   : > { %1417 = vmatprep.subr.bf16.mxu0 %v1640_v1 }
 0x121   : > { %1418 = vmatpush3.bf16.msra.mxu0 %v1531_v20 }
 0x122   : > { %1419 = vmatprep.subr.bf16.mxu0 %v1640_v1 }
 0x125   : > { %1420 = vmatpush3.bf16.msra.mxu0 %v1532_v21 }
 0x18d   : > { %v450_v10 = vpop.f32.mrb[0].mxu0 }
 0x18e   : > { %v451_v11 = vadd.f32 %v450_v10, %v414_v9  ;;  %v1343_v12 = vpop.f32.mrb[1].mxu0 }
 0x18f   : > { %v453_v13 = vpop.f32.mrb[2].mxu0 }
 0x190   : > { %v564_v14 = vpack.c.bf16 %v451_v11, %v451_v11  ;;  %v1344_v15 = vpop.f32.mrb[3].mxu0 }
 0x192   : > { %1402 = vmatmul.mubr.bf16.vlgmr.msra.gmra.mrb[4].mxu1 %v564_v14 }
 0x193   : > { %1441 = vmatprep.mubr.msk.bf16.mxu1 %vm1641_vm1, %v1640_v1  ;;  %1426 = vmatpush3.bf16.msra.mxu1 %v1533_v22 }
 0x194   : > { %1427 = vmatprep.subr.bf16.mxu1 %v1640_v1 }
 0x197   : > { %1428 = vmatpush3.bf16.msra.mxu1 %v1534_v23 }
 0x198   : > { %1429 = vmatprep.subr.bf16.mxu1 %v1640_v1 }
 0x19b   : > { %1430 = vmatpush3.bf16.msra.mxu1 %v1535_v24 }
 0x19c   : > { %1431 = vmatprep.subr.bf16.mxu1 %v1640_v1 }
 0x19f   : > { %1432 = vmatpush3.bf16.msra.mxu1 %v1536_v25 }
 0x1a0   : > { %1433 = vmatprep.subr.bf16.mxu1 %v1640_v1 }
 0x1a3   : > { %1434 = vmatpush3.bf16.msra.mxu1 %v1537_v26 }
 0x1a4   : > { %1435 = vmatprep.subr.bf16.mxu1 %v1640_v1 }
 0x1a7   : > { %1436 = vmatpush3.bf16.msra.mxu1 %v1538_v27 }
 0x1a8   : > { %1437 = vmatprep.subr.bf16.mxu1 %v1640_v1 }
 0x1ab   : > { %1438 = vmatpush3.bf16.msra.mxu1 %v1539_v37 }
 0x1ac   : > { %1439 = vmatprep.subr.bf16.mxu1 %v1640_v1 }
 0x1af   : > { %1440 = vmatpush3.bf16.msra.mxu1 %v1540_v38 }
 0x1db   : > { %v682_v16 = vpop.f32.mrb[4].mxu0 }
 0x1dc   : > { %v1383_v17 = vpop.f32.mrb[5].mxu0 }
 0x1dd   : > { %v685_v18 = vpop.f32.mrb[6].mxu0 }
 0x1de   : > { %v1384_v19 = vpop.f32.mrb[7].mxu0 }
 0x265   : > { %v770_v29 = vpop.f32.mrb[4].mxu1 }
 0x266   : > { %v771_v30 = vadd.f32 %v770_v29, %v682_v16  ;;  %v1403_v31 = vpop.f32.mrb[5].mxu1 }
 0x267   : > { %v773_v32 = vpop.f32.mrb[6].mxu1 }
 0x268   : > { %v778_v33 = vadd.f32 %v776_v28, %v771_v30  ;;  %v1404_v34 = vpop.f32.mrb[7].mxu1 }
 0x26a   : > { %v779_v35 = vmax.f32 %v778_v33, 0.0 }
 0x26c   : > { %v780_v36 = vpack.c.bf16 %v779_v35, %v779_v35 }
 0x26e   : > { %1422 = vmatmul.mubr.bf16.vlgmr.msra.gmra.mrb[8].mxu0 %v780_v36 }
 0x341   : > { %v882_v40 = vpop.f32.mrb[8].mxu0 }
 0x342   : > { %v883_v41 = vadd.f32 %v882_v40, %v846_v39  ;;  %v1423_v42 = vpop.f32.mrb[9].mxu0 }
 0x343   : > { %v885_v43 = vpop.f32.mrb[10].mxu0 }
 0x344   : > { %v888_v44 = vmax.f32 %v883_v41, 0.0  ;;  %v1424_v45 = vpop.f32.mrb[11].mxu0 }
 0x346   : > { %889 = vst [vmem:[%s296_s18] sm:$0x1] %v888_v44  ;;  %v890_v1 = vpack.c.bf16 %v888_v44, %v888_v44 }
 0x348   : > { %1442 = vmatmul.mubr.bf16.vlgmr.msra.gmra.mrb[8].mxu1 %v890_v1 }
 0x349   : > { %1556 = shalt.err (!%p1553_p3)
}
 0x34a   : > { %s1557_s14 = scalar_lea.hbm %s1974_s15, 16  ;;  %s1561_s22 = scalar_lea.hbm %s2050_s6, 32 }
 0x34b   : > { %p1558_p4 = scmp.ne.s32.totalorder %s1974_s15, %s1557_s14  ;;  %p1562_p9 = scmp.lt.u32.totalorder %s1974_s15, %s2050_s6 }
 0x34c   : > { %p1563_p10 = scmp.lt.u32.totalorder %s1561_s22, %s1557_s14  ;;  %p1565_p12 = scmp.lt.u32.totalorder %s1557_s14, %s1974_s15 }
 0x34d   : > { %p1559_p7 = pnand %p1558_p4, %p1722_p5 }
 0x34e   : > { %p1564_p11 = por %p1563_p10, %p1562_p9 }
 0x34f   : > { %p1560_p8 = pneg %p1559_p7 }
 0x350   : > { %p1566_p13 = por %p1565_p12, %p1564_p11 }
 0x352   : > { %p1567_p0 = pnand %p1566_p13, %p1560_p8 }
 0x354   : > { %1570 = shalt.err (!%p1567_p0)
}
 0x355   : > { %1445 = dma.vmem_to_hbm [thread:$0]  (%p1722_p5), %s1017_s21, 16, %s1974_s15, %s1000_s20   ;;  %v955_v46 = vrot.slane %v1888_v57, 5  ;;  %vm997_vm2 = vcmask 24576  }
 0x356   : > { %s302_s29 = scalar_lea.vmem [#allocation4], %s1965_s17  ;;  %s2001_s16 = scalar_lea.hbm %s2051_s7, %s1267_s19 }
 0x357   : > { %s1029_s9 = sshll.u32 %s302_s29, 4  ;;  %s1004_s21 = scalar_lea.sflag [#allocation5], %s1965_s17  ;;  %s2003_s9 = int_to_ptr.vmem [resolvable:$true] %s1029_s9 }
 0x358   : > { %s1571_s15 = scalar_lea.vmem %s2003_s9, 16  ;;  %s1643_s28 = smov [#allocation4]  }
 0x359   : > { %p1572_p1 = scmp.ne.s32.totalorder %s2003_s9, %s1571_s15  ;;  %s1575_s20 = sshll.u32 %s1643_s28, 4  ;;  %s1576_s20 = int_to_ptr.vmem [resolvable:$false] %s1575_s20 }
 0x35a   : > { %s1577_s18 = scalar_lea.vmem %s1576_s20, 32  ;;  %p1578_p4 = scmp.lt.s32.totalorder %s2003_s9, %s1576_s20 }
 0x35b   : > { %p1573_p2 = pnand %p1572_p1, %p1722_p5  ;;  %p1579_p7 = scmp.lt.s32.totalorder %s1577_s18, %s1571_s15 }
 0x35d   : > { %p1574_p3 = pneg %p1573_p2  ;;  %p1580_p8 = por %p1579_p7, %p1578_p4 }
 0x35f   : > { %p1581_p9 = pnand %p1580_p8, %p1574_p3 }
 0x41b   : > { %v991_v47 = vpop.f32.mrb[8].mxu1 }
 0x41c   : > { %v992_v48 = vadd.f32 %v991_v47, %v955_v46  ;;  %v1443_v49 = vpop.f32.mrb[9].mxu1 }
 0x41d   : > { %v994_v50 = vpop.f32.mrb[10].mxu1 }
 0x41e   : > { %v1444_v51 = vpop.f32.mrb[11].mxu1  ;;  %998 = vst.msk [vmem:[%s302_s29] sm:$0x1] %vm997_vm2, %v992_v48 }
 0x41f   : > { %1584 = shalt.err (!%p1581_p9)
}
 0x420   : > { %s1585_s17 = scalar_lea.hbm %s2001_s16, 16  ;;  %s1589_s23 = scalar_lea.hbm %s2051_s7, 32 }
 0x421   : > { %p1586_p10 = scmp.ne.s32.totalorder %s2001_s16, %s1585_s17  ;;  %p1590_p13 = scmp.lt.u32.totalorder %s2001_s16, %s2051_s7 }
 0x422   : > { %p1591_p0 = scmp.lt.u32.totalorder %s1589_s23, %s1585_s17  ;;  %p1593_p2 = scmp.lt.u32.totalorder %s1585_s17, %s2001_s16 }
 0x423   : > { %p1587_p11 = pnand %p1586_p10, %p1722_p5 }
 0x424   : > { %p1592_p1 = por %p1591_p0, %p1590_p13 }
 0x425   : > { %p1588_p12 = pneg %p1587_p11 }
 0x426   : > { %p1594_p3 = por %p1593_p2, %p1592_p1 }
 0x428   : > { %p1595_p4 = pnand %p1594_p3, %p1588_p12 }
 0x42a   : > { %1598 = shalt.err (!%p1595_p4)
}
 0x42b   : > { %1446 = dma.vmem_to_hbm [thread:$0]  (%p1722_p5), %s2003_s9, 16, %s2001_s16, %s1004_s21  }
 0x42c PF: > { %p1456_p7 = scmp.ge.s32.totalorder %s1637_s27, 2  ;;  %s1041_s13 = sand.u32 1, %s1625_s24  }
 0x42d   : > { %s1042_s14 = scalar_lea.sflag [#allocation3], %s1041_s13 }
 0x42e   : > { %p1450_p8 = pnand %p1456_p7, %p1726_p6 }
 0x430   : > { %1616 = dma.done.wait (!%p1450_p8), %s1042_s14, 16  }
 0x431   : > { %1618 = vsyncadd (!%p1450_p8), %s1042_s14, 4294967280  ;;  %s1050_s15 = scalar_lea.sflag [#allocation5], %s1041_s13 }
 0x432   : > { %1620 = dma.done.wait (!%p1450_p8), %s1050_s15, 16  }
 0x433   : > { %1622 = vsyncadd (!%p1450_p8), %s1050_s15, 4294967280  ;;  %p21_p5 = scmp.ge.s32.totalorder %s1709_s30, 4   ;;  %s2054_s24 = smov %s1629_s25 }
 0x434   : > { %s2055_s25 = smov %s1633_s26  ;;  %s2056_s26 = smov %s1720_s10 }
 0x435   : > { %s2057_s27 = smov %s1709_s30  ;;  %23 = sbr.rel (!%p21_p5) target bundleno = 5 (0x5), region = 107 }
 0x43c   :  { %1054 = vsyncpa [#allocation3], 1 }
 0x43d   :  { %1056 = vsyncpa [#allocation3 + $0x1], 1 }
 0x43e   :  { %1057 = vsyncpa [#allocation5], 1 }
 0x43f   :  { %1059 = vsyncpa [#allocation5 + $0x1], 1 }

// kernel: _forward.2
= control target key start
LH: loop header
LB: loop body
LE: loop exit
PB: predicated region body
PF: predicated region fallthrough
CT: control target
= control target key end

     0   :  { %s2720_s0 = inlined_call_operand.vmem [shape: f32[2,8,128], index: 0, kind: input, shape index: {}]   ;;  %s2721_s1 = inlined_call_operand.vmem [shape: f32[2,1,8], index: 1, kind: input, shape index: {}]   ;;  %s2722_s2 = inlined_call_operand.vmem [shape: f32[2,128], index: 2, kind: input, shape index: {}]   ;;  %s2723_s3 = inlined_call_operand.hbm [shape: bf16[2,128,384], index: 3, kind: input, shape index: {}]   ;;  %s2724_s4 = inlined_call_operand.vmem [shape: bf16[2,128,128], index: 4, kind: input, shape index: {}]   ;;  %s2725_s5 = inlined_call_operand.hbm [shape: bf16[2,128,256], index: 5, kind: input, shape index: {}]   ;;  %s2726_s6 = inlined_call_operand.hbm [shape: bf16[2,256,128], index: 6, kind: input, shape index: {}]   ;;  %s2727_s7 = inlined_call_operand.vmem [shape: f32[2,8,384], index: 7, kind: input, shape index: {}]   ;;  %s2728_s8 = inlined_call_operand.vmem [shape: f32[2,8,128], index: 8, kind: output, shape index: {}]  }
   0x1   :  { %2737 = sst [smem:[#allocation16_spill]] %s2723_s3 }
   0x2   :  { %2738 = sst [smem:[#allocation17_spill]] %s2725_s5 }
   0x3   :  { %2739 = sst [smem:[#allocation18_spill]] %s2726_s6 }
   0x4   :  { %13 = vsyncpa [#allocation4], 0 }
   0x5   :  { %15 = vsyncpa [#allocation4 + $0x1], 0 }
   0x6   :  { %16 = vsyncpa [#allocation6], 0 }
   0x7   :  { %18 = vsyncpa [#allocation6 + $0x1], 0  ;;  %s2296_s27 = smov 0   ;;  %s2298_s28 = smov 0  }
   0x8   :  { %s2300_s29 = smov 0   ;;  %s2302_s30 = smov 0  }
   0x9   :  { %s2304_s9 = smov 0   ;;  %s2306_s10 = smov 0  }
   0xa   :  { %s2308_s11 = smov 0   ;;  %s2310_s12 = smov 0  }
   0xb LB: > { %2740 = sst [smem:[#allocation10_spill]] %s2216_s29  ;;  %s2729_s13 = sadd.s32 4294967295, %s2236_s12   ;;  %s2236_s12 = sphi %s2310_s12, %s24_s12   ;;  %s2232_s11 = sphi %s2308_s11, %s2763_s11   ;;  %s2228_s10 = sphi %s2306_s10, %s2762_s10   ;;  %s2224_s9 = sphi %s2304_s9, %s2766_s9   ;;  %s2220_s30 = sphi %s2302_s30, %s2760_s30   ;;  %s2216_s29 = sphi %s2300_s29, %s2759_s29   ;;  %s2212_s28 = sphi %s2298_s28, %s2765_s28   ;;  %s2208_s27 = sphi %s2296_s27, %s2764_s27  }
   0xc   : > { %2741 = sst [smem:[#allocation11_spill]] %s2228_s10  ;;  %s33_s14 = sadd.s32 1, %s2228_s10 }
   0xd   : > { %2742 = sst [smem:[#allocation12_spill]] %s2232_s11  ;;  %p34_p0 = scmp.ge.s32.totalorder %s33_s14, 2 }
   0xe   : > { %s36_s15 = sadd.s32 1, %s2232_s11  ;;  %s116_s16 = sadd.s32 1, %s2216_s29 }
   0xf   : > { %p123_p1 = scmp.ne.s32.totalorder %s2216_s29, %s2212_s28  ;;  %s2768_s14 = smov (%p34_p0, %s33_s14), 0 }
  0x10   : > { %2743 = sst [smem:[#allocation13_spill]] %s2768_s14  ;;  %s2770_s15 = smov (!%p34_p0, %s36_s15), %s2232_s11 }
  0x11   : > { %s113_s17 = ssub.s32 %s2228_s10, %s2768_s14  ;;  %p124_p2 = scmp.eq.s32.totalorder %s2236_s12, 0 }
  0x12   : > { %p38_p3 = scmp.ge.s32.totalorder %s2770_s15, 2  ;;  %p114_p4 = scmp.eq.s32.totalorder %s113_s17, 0 }
  0x13   : > { %p125_p5 = por %p124_p2, %p123_p1  ;;  %p129_p6 = scmp.ne.s32.totalorder %s2212_s28, %s2208_s27 }
  0x14   : > { %s2772_s15 = smov (%p38_p3, %s2770_s15), 0  ;;  %p130_p7 = scmp.eq.s32.totalorder %s2729_s13, 0 }
  0x15   : > { %2744 = sst [smem:[#allocation14_spill]] %s2772_s15  ;;  %p1903_p8 = scmp.lt.s32.totalorder %s2236_s12, 4 }
  0x16   : > { %s2350_s18 = scalar_select %p114_p4, %s2216_s29, %s116_s16  }
  0x17   : > { %s2356_s19 = sand.u32 1, %s2216_s29   ;;  %p2358_p9 = por %p130_p7, %p129_p6 }
  0x18   : > { %2745 = sst [smem:[#allocation15_spill]] %s2350_s18  ;;  %s328_s21 = sand.u32 1, %s2236_s12  }
  0x19   : > { %s2746_s20 = scalar_select %p2358_p9, 1, 0 }
  0x1a   : > { %p2363_p10 = pnand %p1903_p8, %p125_p5  ;;  %s2731_s23 = sshll.u32 %s2356_s19, 7 }
  0x1b   : > { %s2732_s24 = sshll.u32 %s2228_s10, 11  ;;  %s2748_s5 = sld [smem:[#allocation17_spill]] }
  0x1c   : > { %s332_s16 = scalar_lea.vmem [#allocation5], %s2731_s23  ;;  %s2380_s13 = scalar_lea.sflag [#allocation6], %s328_s21 }
  0x1d   : > { %s339_s17 = sshll.u32 %s332_s16, 4  ;;  %p2386_p12 = pneg %p2363_p10  ;;  %s2378_s17 = int_to_ptr.vmem [resolvable:$true] %s339_s17 }
  0x21   : > { %s2374_s27 = scalar_lea.hbm %s2748_s5, %s2732_s24  ;;  %s2081_s23 = scalar_lea.hbm %s2748_s5, 4096 }
  0x22   : > { %s2076_s15 = scalar_lea.hbm %s2374_s27, 2048  ;;  %p2082_p1 = scmp.lt.u32.totalorder %s2374_s27, %s2748_s5 }
  0x23   : > { %p2077_p11 = scmp.ne.s32.totalorder %s2374_s27, %s2076_s15  ;;  %p2083_p2 = scmp.lt.u32.totalorder %s2081_s23, %s2076_s15 }
  0x24   : > { %p2085_p4 = scmp.lt.u32.totalorder %s2076_s15, %s2374_s27 }
  0x25   : > { %p2079_p13 = pnand %p2386_p12, %p2077_p11  ;;  %p2084_p3 = por %p2083_p2, %p2082_p1 }
  0x27   : > { %p2080_p0 = pneg %p2079_p13  ;;  %p2086_p5 = por %p2085_p4, %p2084_p3 }
  0x29   : > { %p2087_p6 = pnand %p2086_p5, %p2080_p0 }
  0x2b   : > { %2090 = shalt.err (!%p2087_p6)
}
  0x2c   : > { %s2091_s21 = scalar_lea.vmem %s2378_s17, 2048  ;;  %s2238_s25 = smov [#allocation5]  }
  0x2d   : > { %p2092_p7 = scmp.ne.s32.totalorder %s2378_s17, %s2091_s21  ;;  %s2096_s26 = sshll.u32 %s2238_s25, 4  ;;  %s2097_s26 = int_to_ptr.vmem [resolvable:$false] %s2096_s26 }
  0x2e   : > { %s2098_s24 = scalar_lea.vmem %s2097_s26, 4096  ;;  %p2099_p13 = scmp.lt.s32.totalorder %s2378_s17, %s2097_s26 }
  0x2f   : > { %p2094_p8 = pnand %p2092_p7, %p2386_p12  ;;  %p2100_p9 = scmp.lt.s32.totalorder %s2098_s24, %s2091_s21 }
  0x31   : > { %p2095_p11 = pneg %p2094_p8  ;;  %p2101_p1 = por %p2100_p9, %p2099_p13 }
  0x33   : > { %p2102_p2 = pnand %p2101_p1, %p2095_p11 }
  0x35   : > { %2105 = shalt.err (!%p2102_p2)
}
  0x36   : > { %s2239_s15 = smov 128   ;;  %s2240_s23 = smov 8  }
  0x37   : > { %1899 = dma.hbm_to_vmem [thread:$0]  (!%p2363_p10), %s2374_s27, 2048, %s2378_s17, %s2380_s13, %s2239_s15, %s2239_s15, %s2240_s23  }
  0x38   : > { %s2750_s16 = sshll.u32 %s2228_s10, 11  ;;  %s2751_s6 = sld [smem:[#allocation18_spill]] }
  0x39   : > { %s2752_s24 = sshll.u32 %s2356_s19, 7  ;;  %p1685_p9 = scmp.ge.s32.totalorder %s2236_s12, 1 }
  0x3a   : > { %s353_s5 = scalar_lea.vmem [#allocation7], %s2752_s24  ;;  %p376_p0 = scmp.lt.s32.totalorder %s2236_s12, 5 }
  0x3b   : > { %s360_s11 = sshll.u32 %s353_s5, 4  ;;  %s1883_s29 = smul.u32 192, %s2356_s19  ;;  %s2419_s11 = int_to_ptr.vmem [resolvable:$true] %s360_s11 }
  0x3c   : > { %p2423_p3 = pnand %p1685_p9, %p376_p0  ;;  %s1884_s27 = smul.u32 3072, %s2228_s10 }
  0x3d   : > { %s2754_s3 = sld [smem:[#allocation16_spill]]  ;;  %s303_s5 = scalar_lea.vmem [#allocation3], %s1883_s29 }
  0x3e   : > { %s2415_s26 = scalar_lea.hbm %s2751_s6, %s2750_s16  ;;  %s310_s16 = sshll.u32 %s303_s5, 4  ;;  %s2434_s16 = int_to_ptr.vmem [resolvable:$true] %s310_s16 }
  0x3f   : > { %s2753_s18 = scalar_select %p2423_p3, 1, 0 }
  0x40   : > { %s300_s21 = scalar_lea.sflag [#allocation4], %s2356_s19 }
  0x43   : > { %s2432_s23 = scalar_lea.hbm %s2754_s3, %s1884_s27  ;;  %s2111_s17 = scalar_lea.hbm %s2754_s3, 6144 }
  0x44   : > { %s2106_s25 = scalar_lea.hbm %s2432_s23, 3072  ;;  %p2112_p7 = scmp.lt.u32.totalorder %s2432_s23, %s2754_s3 }
  0x45   : > { %p2107_p4 = scmp.ne.s32.totalorder %s2432_s23, %s2106_s25  ;;  %p2113_p8 = scmp.lt.u32.totalorder %s2111_s17, %s2106_s25 }
  0x46   : > { %p2115_p13 = scmp.lt.u32.totalorder %s2106_s25, %s2432_s23 }
  0x47   : > { %p2109_p5 = pnand %p2107_p4, %p2386_p12  ;;  %p2114_p11 = por %p2113_p8, %p2112_p7 }
  0x49   : > { %p2110_p6 = pneg %p2109_p5  ;;  %p2116_p1 = por %p2115_p13, %p2114_p11 }
  0x4b   : > { %p2117_p2 = pnand %p2116_p1, %p2110_p6 }
  0x4d   : > { %2120 = shalt.err (!%p2117_p2)
}
  0x4e   : > { %s2121_s29 = scalar_lea.vmem %s2434_s16, 3072  ;;  %s2241_s10 = smov [#allocation3]  }
  0x4f   : > { %p2122_p9 = scmp.ne.s32.totalorder %s2434_s16, %s2121_s29  ;;  %s2126_s5 = sshll.u32 %s2241_s10, 4  ;;  %s2127_s5 = int_to_ptr.vmem [resolvable:$false] %s2126_s5 }
  0x50   : > { %s2128_s24 = scalar_lea.vmem %s2127_s5, 6144  ;;  %p2129_p5 = scmp.lt.s32.totalorder %s2434_s16, %s2127_s5 }
  0x51   : > { %p2124_p0 = pnand %p2122_p9, %p2386_p12  ;;  %p2130_p3 = scmp.lt.s32.totalorder %s2128_s24, %s2121_s29 }
  0x53   : > { %p2125_p4 = pneg %p2124_p0  ;;  %p2131_p7 = por %p2130_p3, %p2129_p5 }
  0x55   : > { %p2132_p8 = pnand %p2131_p7, %p2125_p4 }
  0x57   : > { %2135 = shalt.err (!%p2132_p8)
}
  0x58   : > { %s2242_s25 = smov 192   ;;  %s2243_s17 = smov 12  }
  0x59   : > { %1896 = dma.hbm_to_vmem [thread:$0]  (!%p2363_p10), %s2432_s23, 3072, %s2434_s16, %s300_s21, %s2242_s25, %s2242_s25, %s2243_s17  }
  0x5a   : > { %s2136_s27 = scalar_lea.hbm %s2415_s26, 2048  ;;  %s2141_s10 = scalar_lea.hbm %s2751_s6, 4096 }
  0x5b   : > { %p2137_p6 = scmp.ne.s32.totalorder %s2415_s26, %s2136_s27  ;;  %p2142_p13 = scmp.lt.u32.totalorder %s2415_s26, %s2751_s6 }
  0x5c   : > { %p2143_p1 = scmp.lt.u32.totalorder %s2141_s10, %s2136_s27  ;;  %p2145_p9 = scmp.lt.u32.totalorder %s2136_s27, %s2415_s26 }
  0x5d   : > { %p2139_p3 = pnand %p2137_p6, %p2386_p12 }
  0x5e   : > { %p2144_p2 = por %p2143_p1, %p2142_p13 }
  0x5f   : > { %p2140_p11 = pneg %p2139_p3 }
  0x60   : > { %p2146_p0 = por %p2145_p9, %p2144_p2 }
  0x62   : > { %p2147_p4 = pnand %p2146_p0, %p2140_p11 }
  0x64   : > { %2150 = shalt.err (!%p2147_p4)
}
  0x65   : > { %s2151_s19 = scalar_lea.vmem %s2419_s11, 2048  ;;  %s2244_s23 = smov [#allocation7]  }
  0x66   : > { %p2152_p5 = scmp.ne.s32.totalorder %s2419_s11, %s2151_s19  ;;  %s2156_s16 = sshll.u32 %s2244_s23, 4  ;;  %s2157_s16 = int_to_ptr.vmem [resolvable:$false] %s2156_s16 }
  0x67   : > { %s2158_s21 = scalar_lea.vmem %s2157_s16, 4096  ;;  %p2159_p6 = scmp.lt.s32.totalorder %s2419_s11, %s2157_s16 }
  0x68   : > { %p2154_p7 = pnand %p2152_p5, %p2386_p12  ;;  %p2160_p3 = scmp.lt.s32.totalorder %s2158_s21, %s2151_s19 }
  0x6a   : > { %p2155_p8 = pneg %p2154_p7  ;;  %p2161_p13 = por %p2160_p3, %p2159_p6 }
  0x6c   : > { %p2162_p1 = pnand %p2161_p13, %p2155_p8 }
  0x6e   : > { %2165 = shalt.err (!%p2162_p1)
}
  0x6f   : > { %s2245_s25 = smov 64   ;;  %s2246_s17 = smov 4  }
  0x70   : > { %1902 = dma.hbm_to_vmem [thread:$0]  (!%p2363_p10), %s2415_s26, 2048, %s2419_s11, %s2380_s13, %s2245_s25, %s2245_s25, %s2246_s17  }
  0x71   : > { %p2755_p12 = scmp.ne.s32.totalorder %s2753_s18, 0 }
  0x72   : > { %s382_s14 = sand.u32 (!%p2755_p12), 1, %s2212_s28   ;;  %p2756_p11 = scmp.ne.s32.totalorder (!%p2755_p12), %s2746_s20, 0 }
  0x73   : > { %380 = sbr.rel (%p2755_p12) target bundleno = 3412 (0xd54), region = 52  ;;  %s383_s15 = scalar_lea.sflag (!%p2755_p12), [#allocation4], %s382_s14 }
  0x74   : > { %s1885_s27 = smul.u32 (!%p2755_p12), 192, %s382_s14 }
  0x76   : > { %s2485_s29 = scalar_lea.vmem (!%p2755_p12), [#allocation3], %s1885_s27 }
  0x7a   : > { %2199 = dma.done.wait (%p2756_p11), %s383_s15, 3072  }
  0x7b   : > { %2201 = vsyncadd (%p2756_p11), %s383_s15, 4294964224  ;;  %s2757_s10 = sadd.s32 4294967295, %s2236_s12   ;;  %s1686_s11 = sshll.u32 %s382_s14, 7 }
  0x7c   : > { %s391_s22 = sand.u32 1, %s2757_s10   ;;  %s2493_s18 = scalar_lea.vmem [#allocation5], %s1686_s11 }
  0x7d   : > { %s392_s13 = scalar_lea.sflag [#allocation6], %s391_s22 }
  0x7e   : > { %2203 = dma.done.wait (%p2756_p11), %s392_s13, 4096  }
  0x7f   : > { %2205 = vsyncadd (%p2756_p11), %s392_s13, 4294963200  ;;  %p463_p10 = scmp.lt.s32.totalorder %s2224_s9, 1  ;;  %p470_p2 = scmp.lt.s32.totalorder %s2220_s30, 1 }
  0x80   : > { %s2528_s19 = scalar_lea.vmem [#allocation7], %s1686_s11  ;;  %p1693_p9 = scmp.ne.s32.totalorder %s2220_s30, 0 }
  0x81   : > { %s2774_s9 = smov (!%p463_p10, %s2224_s9), 1  ;;  %v1694_v9 = vld [vmem:[%s2722_s2] ss:$0 sm:$0xff] (!%p1693_p9)  ;;  %v1695_v11 = vld [vmem:[%s2722_s2 + $0x1] ss:$0 sm:$0xff] (!%p1693_p9) }
  0x82   : > { %s471_s26 = scalar_select %p470_p2, %s2220_s30, 1 }
  0x83   : > { %s1688_s5 = sshll.u32 %s2774_s9, 3  ;;  %s469_s23 = scalar_lea.vmem %s2721_s1, %s2774_s9 }
  0x84   : > { %s466_s20 = scalar_lea.vmem %s2720_s0, %s1688_s5  ;;  %s1770_s25 = sshll.u32 %s471_s26, 6 }
  0x85   : > { %s2516_s27 = scalar_lea.vmem %s2724_s4, %s1770_s25  ;;  %s1886_s15 = smul.u32 24, %s471_s26  ;;  %v489_v0 = vld [vmem:[%s466_s20] sm:$0xff] (!%p1693_p9) }
  0x86   : > { %s2521_s13 = scalar_lea.vmem %s2728_s8, %s1688_s5  ;;  %488 = sbr.rel (%p1693_p9) target bundleno = 446 (0x1be), region = 68  ;;  %492 = vadd.xlane.f32.xlu0 (!%p1693_p9), %v489_v0 }
  0x87   : > { %s2526_s24 = scalar_lea.vmem %s2727_s7, %s1886_s15 }
 0x113   : > { %v493_v1 = vpop.xlane.xlu0 %492 }
 0x114   : > { %v495_v2 = vmul.f32 0.0078125, %v493_v1 }
 0x116   : > { %v496_v3 = vsub.f32 %v489_v0, %v495_v2 }
 0x118   : > { %v497_v4 = vmul.f32 %v496_v3, %v496_v3 }
 0x11a   : > { %498 = vadd.xlane.f32.xlu0 %v497_v4 }
 0x1a7   : > { %v499_v5 = vpop.xlane.xlu0 %498 }
 0x1a8   : > { %v500_v6 = vmul.f32 0.0078125, %v499_v5 }
 0x1aa   : > { %v501_v7 = vadd.f32 1e-12, %v500_v6 }
 0x1ac   : > { %1978 = vrsqrt.f32 %v501_v7 }
 0x1b6   : > { %v1979_v8 = vpop.eup %1978 }
 0x1b7   : > { %v503_v10 = vmul.f32 %v1979_v8, %v496_v3 }
 0x1b9   : > { %v508_v12 = vmul.f32 %v1694_v9, %v503_v10 }
 0x1bb   : > { %v513_v13 = vadd.f32 %v1695_v11, %v508_v12 }
 0x1bd   : > { %514 = vst [vmem:[#allocation2] sm:$0xff] %v513_v13 }
 0x1be PF: > { %v1980_v14 = vld [vmem:[%s2485_s29 + $0x4] ss:$12 sps:$4 sm:$0xff]   ;;  %v1982_v15 = vld [vmem:[%s2485_s29] ss:$12 sps:$4 sm:$0xff]   ;;  %v2247_v16 = vmov 0   ;;  %v2248_v17 = vmov 0.0   ;;  %v552_v42 = vlaneseq }
 0x1bf   : > { %724 = vmatprep.mubr.bf16.mxu0 %v2247_v16  ;;  %1819 = vmatprep.subr.bf16.mxu1 %v2248_v17  ;;  %v1983_v18 = vld [vmem:[%s2485_s29 + $0x1c] ss:$12 sps:$4 sm:$0xff]   ;;  %v1985_v19 = vld [vmem:[%s2485_s29 + $0x18] ss:$12 sps:$4 sm:$0xff]   ;;  %v1986_v20 = vld [vmem:[%s2485_s29 + $0x34] ss:$12 sps:$4 sm:$0xff]  }
 0x1c0   : > { %692 = vmatprep.subr.bf16.mxu0 %v1980_v14  ;;  %v1988_v21 = vld [vmem:[%s2485_s29 + $0x30] ss:$12 sps:$4 sm:$0xff]   ;;  %v1989_v22 = vld [vmem:[%s2485_s29 + $0x4c] ss:$12 sps:$4 sm:$0xff]   ;;  %v1991_v23 = vld [vmem:[%s2485_s29 + $0x48] ss:$12 sps:$4 sm:$0xff]  }
 0x1c1   : > { %693 = vmatpush1.bf16.msra.mxu0 %v1982_v15  ;;  %v2004_v24 = vld [vmem:[%s2485_s29 + $0x8] ss:$12 sps:$4 sm:$0xff]   ;;  %v1992_v25 = vld [vmem:[%s2485_s29 + $0x64] ss:$12 sps:$4 sm:$0xff]   ;;  %v2005_v26 = vld [vmem:[%s2485_s29 + $0x20] ss:$12 sps:$4 sm:$0xff]  }
 0x1c2   : > { %694 = vmatprep.subr.bf16.mxu0 %v1983_v18  ;;  %1820 = vmatpush3.bf16.msra.mxu1 %v2004_v24  ;;  %v1994_v27 = vld [vmem:[%s2485_s29 + $0x60] ss:$12 sps:$4 sm:$0xff]   ;;  %v1995_v28 = vld [vmem:[%s2485_s29 + $0x7c] ss:$12 sps:$4 sm:$0xff]   ;;  %v1997_v29 = vld [vmem:[%s2485_s29 + $0x78] ss:$12 sps:$4 sm:$0xff]  }
 0x1c3   : > { %1821 = vmatprep.subr.bf16.mxu1 %v2248_v17  ;;  %v2006_v30 = vld [vmem:[%s2485_s29 + $0x38] ss:$12 sps:$4 sm:$0xff]   ;;  %v1998_v31 = vld [vmem:[%s2485_s29 + $0x94] ss:$12 sps:$4 sm:$0xff]   ;;  %v2007_v32 = vld [vmem:[%s2485_s29 + $0x50] ss:$12 sps:$4 sm:$0xff]  }
 0x1c4   : > { %v2000_v33 = vld [vmem:[%s2485_s29 + $0x90] ss:$12 sps:$4 sm:$0xff]   ;;  %v2001_v34 = vld [vmem:[%s2485_s29 + $0xac] ss:$12 sps:$4 sm:$0xff]   ;;  %v2008_v35 = vld [vmem:[%s2485_s29 + $0x68] ss:$12 sps:$4 sm:$0xff]  }
 0x1c5   : > { %695 = vmatpush1.bf16.msra.mxu0 %v1985_v19  ;;  %v2003_v36 = vld [vmem:[%s2485_s29 + $0xa8] ss:$12 sps:$4 sm:$0xff]   ;;  %v2563_v37 = vld [vmem:[#allocation2] sm:$0xff]  ;;  %v2009_v38 = vld [vmem:[%s2485_s29 + $0x80] ss:$12 sps:$4 sm:$0xff]   ;;  %vm2249_vm0 = vmmov 0  }
 0x1c6   : > { %696 = vmatprep.subr.bf16.mxu0 %v1986_v20  ;;  %1822 = vmatpush3.bf16.msra.mxu1 %v2005_v26  ;;  %v516_v39 = vpack.c.bf16 %v2563_v37, %v2563_v37  ;;  %v2010_v40 = vld [vmem:[%s2485_s29 + $0x98] ss:$12 sps:$4 sm:$0xff]   ;;  %v2011_v41 = vld [vmem:[%s2485_s29 + $0xb0] ss:$12 sps:$4 sm:$0xff]   ;;  %v2582_v43 = vshrl.u32 %v552_v42, 7  ;;  %vm777_vm1 = vcmask 523264  }
 0x1c7   : > { %1823 = vmatprep.subr.bf16.mxu1 %v2248_v17  ;;  %1835 = vmatprep.mubr.msk.bf16.mxu1 %vm2249_vm0, %v2248_v17  ;;  %v2586_v45 = vld [vmem:[%s2526_s24 + $0x8] sm:$0xff]  ;;  %v2589_v46 = vld [vmem:[%s2526_s24] sm:$0xff]  ;;  %s2250_s29 = smov 64   ;;  %v519_v58 = vld [vmem:[%s2526_s24 + $0x10] sm:$0xff]  ;;  %vm848_vm2 = vcmask 1043456   ;;  %vm832_vm3 = vcmask 64512  }
 0x1c8   : > { %v554_v44 = vsub.s32 0, %v2582_v43  ;;  %v1721_v4 = vld [vmem:[%s469_s23] ss:$0 sm:$0xff]  ;;  %p1765_p0 = scmp.ne.s32.totalorder %s2220_s30, 1 }
 0x1c9   : > { %697 = vmatpush1.bf16.msra.mxu0 %v1988_v21 }
 0x1ca   : > { %698 = vmatprep.subr.bf16.mxu0 %v1989_v22  ;;  %1824 = vmatpush3.bf16.msra.mxu1 %v2006_v30  ;;  %v559_v47 = vrot.slane %v2586_v45, %v554_v44  ;;  %v555_v48 = vrot.slane %v2589_v46, %v554_v44  ;;  %v563_v59 = vrot.slane %v519_v58, %v554_v44 }
 0x1cb   : > { %1825 = vmatprep.subr.bf16.mxu1 %v2248_v17 }
 0x1cd   : > { %699 = vmatpush1.bf16.msra.mxu0 %v1991_v23 }
 0x1ce   : > { %700 = vmatprep.subr.bf16.mxu0 %v1992_v25  ;;  %1826 = vmatpush3.bf16.msra.mxu1 %v2007_v32 }
 0x1cf   : > { %1827 = vmatprep.subr.bf16.mxu1 %v2248_v17 }
 0x1d1   : > { %701 = vmatpush1.bf16.msra.mxu0 %v1994_v27 }
 0x1d2   : > { %702 = vmatprep.subr.bf16.mxu0 %v1995_v28  ;;  %1828 = vmatpush3.bf16.msra.mxu1 %v2008_v35 }
 0x1d3   : > { %1829 = vmatprep.subr.bf16.mxu1 %v2248_v17 }
 0x1d5   : > { %703 = vmatpush1.bf16.msra.mxu0 %v1997_v29 }
 0x1d6   : > { %704 = vmatprep.subr.bf16.mxu0 %v1998_v31  ;;  %1830 = vmatpush3.bf16.msra.mxu1 %v2009_v38 }
 0x1d7   : > { %1831 = vmatprep.subr.bf16.mxu1 %v2248_v17 }
 0x1d9   : > { %705 = vmatpush1.bf16.msra.mxu0 %v2000_v33 }
 0x1da   : > { %706 = vmatprep.subr.bf16.mxu0 %v2001_v34  ;;  %1832 = vmatpush3.bf16.msra.mxu1 %v2010_v40 }
 0x1db   : > { %1833 = vmatprep.subr.bf16.mxu1 %v2248_v17 }
 0x1dd   : > { %707 = vmatpush1.bf16.msra.mxu0 %v2003_v36 }
 0x1de   : > { %1863 = vmatprep.subr.bf16.mxu0 %v2248_v17  ;;  %1834 = vmatpush3.bf16.msra.mxu1 %v2011_v41 }
 0x1df   : > { %1839 = vmatprep.subr.bf16.mxu1 %v2248_v17 }
 0x1e0   : > { %725 = vmatmul.mubr.bf16.vlgmr.msra.gmra.mrb[0].mxu0 %v516_v39 }
 0x1e1   : > { %1879 = vmatprep.mubr.msk.bf16.mxu0 %vm2249_vm0, %v2248_v17  ;;  %1836 = vmatmul.mubr.bf16.vlgmr.msra.gmra.mrb[0].mxu1 %v516_v39 }
 0x1e2   : > { %1841 = vmatprep.mubr.msk.bf16.mxu1 %vm2249_vm0, %v2248_v17 }
 0x2b3   : > { %v726_v49 = vpop.f32.mrb[0].mxu0 }
 0x2b4   : > { %v728_v50 = vpop.f32.mrb[1].mxu0  ;;  %v727_v54 = vadd.f32 %v726_v49, %v555_v48  ;;  %v767_v60 = vpop.f32.mrb[0].mxu1 }
 0x2b5   : > { %v729_v51 = vadd.f32 %v728_v50, %v559_v47  ;;  %v730_v52 = vpop.f32.mrb[2].mxu0  ;;  %v768_v61 = vadd.f32 %v767_v60, %v563_v59  ;;  %v1837_v62 = vpop.f32.mrb[1].mxu1 }
 0x2b6   : > { %v731_v53 = vpop.f32.mrb[3].mxu0  ;;  %v773_v57 = vpack.c.bf16 %v727_v54, %v727_v54  ;;  %v770_v63 = vpop.f32.mrb[2].mxu1  ;;  %v2013_v52 = vld [vmem:[%s2516_s27 + $0x8] sm:$0xff]   ;;  %v2015_v54 = vld [vmem:[%s2516_s27 + $0x18] sm:$0xff]  }
 0x2b7   : > { %v774_v55 = vpack.c.bf16 %v729_v51, %v729_v51  ;;  %v775_v0 = vpack.c.bf16 %v768_v61, %v768_v61  ;;  %v1838_v1 = vpop.f32.mrb[3].mxu1  ;;  %v2012_v51 = vld [vmem:[%s2516_s27] sm:$0xff]   ;;  %v2014_v53 = vld [vmem:[%s2516_s27 + $0x10] sm:$0xff]  }
 0x2b8   : > { %1864 = vmatpush3.bf16.msra.mxu0 %v2012_v51  ;;  %v1031_v1 = vsub.s32 1, %v2582_v43  ;;  %v2050_v51 = vld [vmem:[%s2528_s19 + $0x58] sm:$0xff]  }
 0x2b9   : > { %v782_v56 = vsel %vm777_vm1, %v774_v55, 0  ;;  %896 = vrot.lane.b32.xlu1 %v774_v55, %s2250_s29  ;;  %v850_v2 = vsel %vm848_vm2, %v775_v0, 0  ;;  %1865 = vmatprep.subr.bf16.mxu0 %v2248_v17  ;;  %v2016_v55 = vld [vmem:[%s2516_s27 + $0x20] sm:$0xff]  }
 0x2ba   : > { %1840 = vmatpush3.bf16.xpose.msra.mxu1 %v782_v56  ;;  %v2018_v56 = vld [vmem:[%s2516_s27 + $0x30] sm:$0xff]  }
 0x2bb   : > { %1845 = vmatprep.subr.bf16.mxu1 %v2248_v17 }
 0x2bc   : > { %1866 = vmatpush3.bf16.msra.mxu0 %v2013_v52  ;;  %v2051_v52 = vld [vmem:[%s2528_s19 + $0x18] sm:$0xff]  }
 0x2bd   : > { %893 = vrot.lane.b32.xlu1 %v773_v57, %s2250_s29  ;;  %1867 = vmatprep.subr.bf16.mxu0 %v2248_v17 }
 0x2c0   : > { %1868 = vmatpush3.bf16.msra.mxu0 %v2014_v53  ;;  %v2052_v53 = vld [vmem:[%s2528_s19 + $0x60] sm:$0xff]  }
 0x2c1   : > { %1842 = vmatmul.mubr.msk.bf16.vlgmr.msra.gmra.mrb[4].mxu1 %vm777_vm1, %v773_v57  ;;  %1869 = vmatprep.subr.bf16.mxu0 %v2248_v17  ;;  %v2019_v57 = vld [vmem:[%s2516_s27 + $0x38] sm:$0xff]  }
 0x2c2   : > { %1847 = vmatprep.mubr.msk.bf16.mxu1 %vm2249_vm0, %v2248_v17  ;;  %1846 = vmatpush3.bf16.msra.mxu1 %v850_v2 }
 0x2c3   : > { %1851 = vmatprep.subr.bf16.mxu1 %v2248_v17 }
 0x2c4   : > { %1870 = vmatpush3.bf16.msra.mxu0 %v2015_v54  ;;  %v2053_v54 = vld [vmem:[%s2528_s19 + $0x20] sm:$0xff]  }
 0x2c5   : > { %1871 = vmatprep.subr.bf16.mxu0 %v2248_v17 }
 0x2c8   : > { %1872 = vmatpush3.bf16.msra.mxu0 %v2016_v55  ;;  %v2054_v55 = vld [vmem:[%s2528_s19 + $0x68] sm:$0xff]  }
 0x2c9   : > { %1873 = vmatprep.subr.bf16.mxu0 %v2248_v17 }
 0x32b   : > { %v897_v21 = vpop.permute.xlu1 %896 }
 0x32c   : > { %v902_v23 = vsel %vm777_vm1, %v897_v21, 0  ;;  %v2034_v21 = vld [vmem:[%s2493_s18 + $0x44] ss:$8 sps:$4 sm:$0xff]  }
 0x32f   : > { %v894_v24 = vpop.permute.xlu1 %893 }
 0x394   : > { %v818_v3 = vpop.f32.mrb[4].mxu1 }
 0x395   : > { %v824_v5 = vmul.f32 0.125, %v818_v3  ;;  %v1843_v6 = vpop.f32.mrb[5].mxu1 }
 0x396   : > { %v821_v7 = vpop.f32.mrb[6].mxu1 }
 0x397   : > { %v1844_v8 = vpop.f32.mrb[7].mxu1  ;;  %v831_v9 = vadd.f32 %v1721_v4, %v824_v5 }
 0x398   : > { %v2020_v8 = vld [vmem:[%s2493_s18] ss:$8 sps:$4 sm:$0xff]  }
 0x399   : > { %v833_v10 = vsel %vm832_vm3, %v831_v9, -inf }
 0x39a   : > { %834 = vmax.xlane.f32.xlu0 %v833_v10  ;;  %v2025_v10 = vld [vmem:[%s2493_s18 + $0x14] ss:$8 sps:$4 sm:$0xff]  }
 0x427   : > { %v835_v11 = vpop.xlane.xlu0 %834 }
 0x428   : > { %v836_v12 = vsub.f32 %v831_v9, %v835_v11  ;;  %v2022_v9 = vld [vmem:[%s2493_s18 + $0x4] ss:$8 sps:$4 sm:$0xff]   ;;  %v2023_v11 = vld [vmem:[%s2493_s18 + $0x10] ss:$8 sps:$4 sm:$0xff]  }
 0x42a   : > { %v837_v13 = vmul.f32 1.442695, %v836_v12  ;;  %v2028_v12 = vld [vmem:[%s2493_s18 + $0x24] ss:$8 sps:$4 sm:$0xff]  }
 0x42c   : > { %2060 = vpow2.f32 %v837_v13  ;;  %v2026_v13 = vld [vmem:[%s2493_s18 + $0x20] ss:$8 sps:$4 sm:$0xff]  }
 0x436   : > { %v2061_v14 = vpop.eup %2060 }
 0x437   : > { %v839_v15 = vsel %vm832_vm3, %v2061_v14, 0.0 }
 0x438   : > { %840 = vadd.xlane.f32.xlu0 %v839_v15 }
 0x4c5   : > { %v841_v18 = vpop.xlane.xlu0 %840 }
 0x4c6   : > { %2062 = vrcp.f32 %v841_v18 }
 0x4d0   : > { %v2063_v19 = vpop.eup %2062 }
 0x4d1   : > { %v843_v20 = vmul.f32 %v2063_v19, %v2061_v14  ;;  %v2031_v19 = vld [vmem:[%s2493_s18 + $0x34] ss:$8 sps:$4 sm:$0xff]  }
 0x4d3   : > { %v844_v22 = vpack.c.bf16 %v843_v20, %v843_v20  ;;  %v2029_v20 = vld [vmem:[%s2493_s18 + $0x30] ss:$8 sps:$4 sm:$0xff]  }
 0x4d5   : > { %1848 = vmatmul.mubr.msk.bf16.vlgmr.msra.gmra.mrb[8].mxu1 %vm832_vm3, %v844_v22  ;;  %v2032_v22 = vld [vmem:[%s2493_s18 + $0x40] ss:$8 sps:$4 sm:$0xff]  }
 0x4d6   : > { %1852 = vmatpush3.bf16.xpose.msra.mxu1 %v902_v23  ;;  %1853 = vmatprep.mubr.msk.bf16.mxu1 %vm2249_vm0, %v2248_v17  ;;  %v2037_v23 = vld [vmem:[%s2493_s18 + $0x54] ss:$8 sps:$4 sm:$0xff]  }
 0x4d7   : > { %1857 = vmatprep.subr.bf16.mxu1 %v2248_v17 }
 0x4dd   : > { %1854 = vmatmul.mubr.msk.bf16.vlgmr.msra.gmra.mrb[12].mxu1 %vm777_vm1, %v894_v24  ;;  %v2035_v24 = vld [vmem:[%s2493_s18 + $0x50] ss:$8 sps:$4 sm:$0xff]  }
 0x4de   : > { %1859 = vmatprep.mubr.msk.bf16.mxu1 %vm2249_vm0, %v2248_v17 }
 0x5a8   : > { %v886_v25 = vpop.f32.mrb[8].mxu1 }
 0x5a9   : > { %v1849_v26 = vpop.f32.mrb[9].mxu1 }
 0x5aa   : > { %v889_v27 = vpop.f32.mrb[10].mxu1  ;;  %v2038_v26 = vld [vmem:[%s2493_s18 + $0x60] ss:$8 sps:$4 sm:$0xff]  }
 0x5ab   : > { %v1850_v28 = vpop.f32.mrb[11].mxu1  ;;  %v2043_v27 = vld [vmem:[%s2493_s18 + $0x74] ss:$8 sps:$4 sm:$0xff]  }
 0x5ac   : > { %v2041_v28 = vld [vmem:[%s2493_s18 + $0x70] ss:$8 sps:$4 sm:$0xff]  }
 0x5b0   : > { %v938_v29 = vpop.f32.mrb[12].mxu1 }
 0x5b1   : > { %v944_v30 = vmul.f32 0.125, %v938_v29  ;;  %v1855_v31 = vpop.f32.mrb[13].mxu1 }
 0x5b2   : > { %v941_v32 = vpop.f32.mrb[14].mxu1 }
 0x5b3   : > { %v1856_v33 = vpop.f32.mrb[15].mxu1  ;;  %v945_v34 = vadd.f32 %v1721_v4, %v944_v30  ;;  %v1136_v32 = vsub.s32 4, %v2582_v43 }
 0x5b4   : > { %v1141_v33 = vsub.s32 5, %v2582_v43 }
 0x5b5   : > { %v946_v35 = vsel %vm832_vm3, %v945_v34, -inf }
 0x5b6   : > { %947 = vmax.xlane.f32.xlu0 %v946_v35 }
 0x5cc   : > { %959 = vrot.lane.b32.xlu0 %v775_v0, %s2250_s29 }
 0x643   : > { %v948_v36 = vpop.xlane.xlu0 %947 }
 0x644   : > { %v949_v38 = vsub.f32 %v945_v34, %v948_v36  ;;  %v1137_v34 = vrot.slane %v2589_v46, %v1136_v32 }
 0x646   : > { %v950_v39 = vmul.f32 1.442695, %v949_v38  ;;  %v1142_v38 = vrot.slane %v2589_v46, %v1141_v33 }
 0x647   : > { %v960_v40 = vpop.permute.xlu0 %959 }
 0x648   : > { %2064 = vpow2.f32 %v950_v39  ;;  %v965_v41 = vsel %vm848_vm2, %v960_v40, 0 }
 0x649   : > { %1858 = vmatpush3.bf16.msra.mxu1 %v965_v41 }
 0x64a   : > { %1249 = vmatprep.subr.bf16.mxu1 %v2022_v9 }
 0x652   : > { %v2065_v42 = vpop.eup %2064 }
 0x653   : > { %v952_v44 = vsel %vm832_vm3, %v2065_v42, 0.0 }
 0x654   : > { %953 = vadd.xlane.f32.xlu1 %v952_v44  ;;  %v2045_v44 = vld [vmem:[%s2528_s19] sm:$0xff]  }
 0x6e1   : > { %v954_v47 = vpop.xlane.xlu1 %953 }
 0x6e2   : > { %2066 = vrcp.f32 %v954_v47  ;;  %v2046_v47 = vld [vmem:[%s2528_s19 + $0x48] sm:$0xff]  }
 0x6ec   : > { %v2067_v48 = vpop.eup %2066 }
 0x6ed   : > { %v956_v49 = vmul.f32 %v2067_v48, %v2065_v42  ;;  %v2044_v42 = vld [vmem:[%s2528_s19 + $0x40] sm:$0xff]   ;;  %v2047_v48 = vld [vmem:[%s2528_s19 + $0x8] sm:$0xff]  }
 0x6ef   : > { %v957_v50 = vpack.c.bf16 %v956_v49, %v956_v49  ;;  %v2048_v49 = vld [vmem:[%s2528_s19 + $0x50] sm:$0xff]  }
 0x6f1   : > { %1860 = vmatmul.mubr.msk.bf16.vlgmr.msra.gmra.mrb[16].mxu1 %vm832_vm3, %v957_v50  ;;  %v2049_v50 = vld [vmem:[%s2528_s19 + $0x10] sm:$0xff]  }
 0x6f2   : > { %1281 = vmatprep.mubr.bf16.mxu1 %v2247_v16  ;;  %v2017_v16 = vld [vmem:[%s2516_s27 + $0x28] sm:$0xff]   ;;  %1250 = vmatpush1.bf16.msra.mxu1 %v2020_v8 }
 0x6f3   : > { %1874 = vmatpush3.bf16.msra.mxu0 %v2017_v16  ;;  %1251 = vmatprep.subr.bf16.mxu1 %v2025_v10  ;;  %v2055_v16 = vld [vmem:[%s2528_s19 + $0x28] sm:$0xff]  }
 0x6f4   : > { %1875 = vmatprep.subr.bf16.mxu0 %v2248_v17 }
 0x6f6   : > { %1252 = vmatpush1.bf16.msra.mxu1 %v2023_v11 }
 0x6f7   : > { %1876 = vmatpush3.bf16.msra.mxu0 %v2018_v56  ;;  %1253 = vmatprep.subr.bf16.mxu1 %v2028_v12  ;;  %v2056_v56 = vld [vmem:[%s2528_s19 + $0x70] sm:$0xff]  }
 0x6f8   : > { %1877 = vmatprep.subr.bf16.mxu0 %v2248_v17  ;;  %v1032_v17 = vrot.slane %v2589_v46, %v1031_v1 }
 0x6fa   : > { %1254 = vmatpush1.bf16.msra.mxu1 %v2026_v13 }
 0x6fb   : > { %1878 = vmatpush3.bf16.msra.mxu0 %v2019_v57  ;;  %1255 = vmatprep.subr.bf16.mxu1 %v2031_v19  ;;  %v2057_v57 = vld [vmem:[%s2528_s19 + $0x30] sm:$0xff]  }
 0x6fc   : > { %1797 = vmatprep.subr.bf16.mxu0 %v2044_v42  ;;  %v1496_v42 = vsub.s32 6, %v2582_v43 }
 0x6fe   : > { %1256 = vmatpush1.bf16.msra.mxu1 %v2029_v20 }
 0x6ff   : > { %1257 = vmatprep.subr.bf16.mxu1 %v2034_v21 }
 0x702   : > { %1258 = vmatpush1.bf16.msra.mxu1 %v2032_v22 }
 0x703   : > { %1259 = vmatprep.subr.bf16.mxu1 %v2037_v23 }
 0x706   : > { %1260 = vmatpush1.bf16.msra.mxu1 %v2035_v24  ;;  %v1344_v24 = vsub.s32 3, %v2582_v43 }
 0x7c4   : > { %v1001_v58 = vpop.f32.mrb[16].mxu1 }
 0x7c5   : > { %1008 = vrot.lane.b32.xlu0 %v1001_v58, %s2250_s29  ;;  %v1861_v59 = vpop.f32.mrb[17].mxu1  ;;  %v2058_v58 = vld [vmem:[%s2528_s19 + $0x78] sm:$0xff]  }
 0x7c6   : > { %v1004_v60 = vpop.f32.mrb[18].mxu1  ;;  %v2059_v59 = vld [vmem:[%s2528_s19 + $0x38] sm:$0xff]  }
 0x7c7   : > { %v1862_v61 = vpop.f32.mrb[19].mxu1  ;;  %v1163_v60 = vsub.s32 2, %v2582_v43 }
 0x7c9   : > { %v1164_v61 = vrot.slane %v2589_v46, %v1163_v60 }
 0x837   : > { %v1009_v62 = vpop.permute.xlu0 %1008 }
 0x838   : > { %v1011_v63 = vsel %vm777_vm1, %v886_v25, %v1009_v62  ;;  %v2040_v25 = vld [vmem:[%s2493_s18 + $0x64] ss:$8 sps:$4 sm:$0xff]   ;;  %v1168_v62 = vrot.slane %v2586_v45, %v1163_v60 }
 0x839   : > { %v1012_v0 = vpack.c.bf16 %v1011_v63, %v1011_v63  ;;  %1261 = vmatprep.subr.bf16.mxu1 %v2040_v25 }
 0x83a   : > { %1262 = vmatpush1.bf16.msra.mxu1 %v2038_v26  ;;  %v1345_v26 = vrot.slane %v2589_v46, %v1344_v24 }
 0x83b   : > { %1880 = vmatmul.mubr.bf16.vlgmr.msra.gmra.mrb[4].mxu0 %v1012_v0  ;;  %1263 = vmatprep.subr.bf16.mxu1 %v2043_v27 }
 0x83c   : > { %1798 = vmatpush3.bf16.msra.mxu0 %v2045_v44  ;;  %v1501_v44 = vsub.s32 7, %v2582_v43 }
 0x83d   : > { %1799 = vmatprep.subr.bf16.mxu0 %v2046_v47  ;;  %v1497_v47 = vrot.slane %v2589_v46, %v1496_v42 }
 0x83e   : > { %1264 = vmatpush1.bf16.msra.mxu1 %v2041_v28 }
 0x840   : > { %1800 = vmatpush3.bf16.msra.mxu0 %v2047_v48 }
 0x841   : > { %1801 = vmatprep.subr.bf16.mxu0 %v2048_v49  ;;  %v1502_v49 = vrot.slane %v2589_v46, %v1501_v44 }
 0x844   : > { %1802 = vmatpush3.bf16.msra.mxu0 %v2049_v50 }
 0x845   : > { %1803 = vmatprep.subr.bf16.mxu0 %v2050_v51 }
 0x848   : > { %1804 = vmatpush3.bf16.msra.mxu0 %v2051_v52 }
 0x849   : > { %1805 = vmatprep.subr.bf16.mxu0 %v2052_v53 }
 0x84c   : > { %1806 = vmatpush3.bf16.msra.mxu0 %v2053_v54 }
 0x84d   : > { %1807 = vmatprep.subr.bf16.mxu0 %v2054_v55 }
 0x850   : > { %1808 = vmatpush3.bf16.msra.mxu0 %v2055_v16 }
 0x851   : > { %1809 = vmatprep.subr.bf16.mxu0 %v2056_v56 }
 0x854   : > { %1810 = vmatpush3.bf16.msra.mxu0 %v2057_v57 }
 0x855   : > { %1811 = vmatprep.subr.bf16.mxu0 %v2058_v58 }
 0x858   : > { %1812 = vmatpush3.bf16.msra.mxu0 %v2059_v59 }
 0x90e   : > { %v1115_v2 = vpop.f32.mrb[4].mxu0 }
 0x90f   : > { %v1116_v3 = vadd.f32 %v1115_v2, %v1032_v17  ;;  %v1881_v4 = vpop.f32.mrb[5].mxu0 }
 0x910   : > { %v1118_v5 = vpop.f32.mrb[6].mxu0 }
 0x911   : > { %v1882_v6 = vpop.f32.mrb[7].mxu0  ;;  %v1121_v7 = vadd.f32 %v1116_v3, %v2563_v37 }
 0x913   : > { %1122 = vadd.xlane.f32.xlu0 %v1121_v7 }
 0x9a0   : > { %v1123_v37 = vpop.xlane.xlu0 %1122 }
 0x9a1   : > { %v1125_v14 = vmul.f32 0.0078125, %v1123_v37 }
 0x9a3   : > { %v1126_v15 = vsub.f32 %v1121_v7, %v1125_v14 }
 0x9a5   : > { %v1127_v18 = vmul.f32 %v1126_v15, %v1126_v15 }
 0x9a7   : > { %1128 = vadd.xlane.f32.xlu1 %v1127_v18 }
 0xa34   : > { %v1129_v29 = vpop.xlane.xlu1 %1128 }
 0xa35   : > { %v1130_v30 = vmul.f32 0.0078125, %v1129_v29 }
 0xa37   : > { %v1131_v31 = vadd.f32 1e-12, %v1130_v30 }
 0xa39   : > { %2068 = vrsqrt.f32 %v1131_v31 }
 0xa43   : > { %v2069_v35 = vpop.eup %2068 }
 0xa44   : > { %v1133_v36 = vmul.f32 %v2069_v35, %v1126_v15 }
 0xa46   : > { %v1138_v39 = vmul.f32 %v1137_v34, %v1133_v36 }
 0xa48   : > { %v2664_v40 = vadd.f32 %v1142_v38, %v1138_v39 }
 0xa4a   : > { %v1144_v41 = vpack.c.bf16 %v2664_v40, %v2664_v40 }
 0xa4c   : > { %1282 = vmatmul.mubr.bf16.vlgmr.msra.gmra.mrb[20].mxu1 %v1144_v41 }
 0xb1f   : > { %v1283_v63 = vpop.f32.mrb[20].mxu1 }
 0xb20   : > { %v1284_v0 = vadd.f32 %v1283_v63, %v1164_v61  ;;  %v1285_v1 = vpop.f32.mrb[21].mxu1 }
 0xb21   : > { %v1286_v17 = vadd.f32 %v1285_v1, %v1168_v62  ;;  %v1287_v2 = vpop.f32.mrb[22].mxu1 }
 0xb22   : > { %v1290_v3 = vmul.f32 %v1284_v0, %v1284_v0  ;;  %v1288_v4 = vpop.f32.mrb[23].mxu1 }
 0xb23   : > { %v1291_v5 = vmul.f32 %v1286_v17, %v1286_v17 }
 0xb24   : > { %v1292_v6 = vmul.f32 %v1290_v3, %v1284_v0 }
 0xb25   : > { %v1293_v7 = vmul.f32 %v1291_v5, %v1286_v17 }
 0xb26   : > { %v1294_v8 = vmul.f32 0.044715, %v1292_v6 }
 0xb27   : > { %v1295_v9 = vmul.f32 0.044715, %v1293_v7 }
 0xb28   : > { %v1296_v10 = vadd.f32 %v1294_v8, %v1284_v0 }
 0xb29   : > { %v1297_v11 = vadd.f32 %v1295_v9, %v1286_v17 }
 0xb2a   : > { %v1298_v12 = vmul.f32 0.7978846, %v1296_v10 }
 0xb2b   : > { %v1299_v13 = vmul.f32 0.7978846, %v1297_v11 }
 0xb2c   : > { %2070 = vtanh.f32 %v1298_v12 }
 0xb2d   : > { %2072 = vtanh.f32 %v1299_v13 }
 0xb36   : > { %v2071_v37 = vpop.eup %2070 }
 0xb37   : > { %v2073_v45 = vpop.eup %2072  ;;  %v1302_v14 = vadd.f32 1.0, %v2071_v37 }
 0xb38   : > { %v1303_v15 = vadd.f32 1.0, %v2073_v45 }
 0xb39   : > { %v1304_v18 = vmul.f32 0.5, %v1302_v14 }
 0xb3a   : > { %v1305_v19 = vmul.f32 0.5, %v1303_v15 }
 0xb3b   : > { %v1306_v20 = vmul.f32 %v1304_v18, %v1284_v0 }
 0xb3c   : > { %v1307_v21 = vmul.f32 %v1305_v19, %v1286_v17 }
 0xb3d   : > { %v1308_v23 = vpack.c.bf16 %v1306_v20, %v1306_v20 }
 0xb3e   : > { %v1309_v22 = vpack.c.bf16 %v1307_v21, %v1307_v21 }
 0xb40   : > { %1474 = vmatprep.mubr.bf16.mxu0 %v1309_v22 }
 0xb41   : > { %1475 = vmatmul.mubr.bf16.vlgmr.msra.gmra.mrb[8].mxu0 %v1308_v23 }
 0xc14   : > { %v1813_v25 = vpop.f32.mrb[8].mxu0 }
 0xc15   : > { %v1814_v27 = vpop.f32.mrb[9].mxu0 }
 0xc16   : > { %v1815_v28 = vadd.f32 %v1814_v27, %v1813_v25  ;;  %v1816_v29 = vpop.f32.mrb[10].mxu0 }
 0xc17   : > { %v1817_v30 = vpop.f32.mrb[11].mxu0 }
 0xc18   : > { %v1477_v31 = vadd.f32 %v1815_v28, %v1345_v26 }
 0xc1a   : > { %v1482_v32 = vadd.f32 %v1477_v31, %v2664_v40 }
 0xc1c   : > { %1483 = vadd.xlane.f32.xlu1 %v1482_v32 }
 0xca9   : > { %v1484_v33 = vpop.xlane.xlu1 %1483 }
 0xcaa   : > { %v1485_v34 = vmul.f32 0.0078125, %v1484_v33 }
 0xcac   : > { %v1486_v35 = vsub.f32 %v1482_v32, %v1485_v34 }
 0xcae   : > { %v1487_v36 = vmul.f32 %v1486_v35, %v1486_v35 }
 0xcb0   : > { %1488 = vadd.xlane.f32.xlu1 %v1487_v36 }
 0xd3d   : > { %v1489_v38 = vpop.xlane.xlu1 %1488 }
 0xd3e   : > { %v1490_v39 = vmul.f32 0.0078125, %v1489_v38 }
 0xd40   : > { %v1491_v41 = vadd.f32 1e-12, %v1490_v39 }
 0xd42   : > { %2074 = vrsqrt.f32 %v1491_v41 }
 0xd4c   : > { %v2075_v48 = vpop.eup %2074 }
 0xd4d   : > { %v1493_v40 = vmul.f32 %v2075_v48, %v1486_v35  ;;  %1508 = sbr.rel (%p1765_p0) target bundleno = 3412 (0xd54), region = 72 }
 0xd4f   : > { %v1498_v50 = vmul.f32 %v1497_v47, %v1493_v40 }
 0xd51   : > { %v1503_v51 = vadd.f32 %v1502_v49, %v1498_v50 }
 0xd53   : > { %1504 = vst [vmem:[#allocation2] sm:$0xff] %v1503_v51  ;;  %1509 = vst [vmem:[%s2521_s13] sm:$0xff] (!%p1765_p0), %v1503_v51 }
 0xd54 PF: > { %s24_s12 = sadd.s32 1, %s2236_s12   ;;  %s2758_s9 = sld [smem:[#allocation10_spill]] }
 0xd55   : > { %p21_p4 = scmp.ge.s32.totalorder %s24_s12, 6   ;;  %s2759_s29 = sld [smem:[#allocation15_spill]] }
 0xd56   : > { %s2760_s30 = sld [smem:[#allocation11_spill]]  ;;  %s2761_s18 = sld [smem:[#allocation12_spill]] }
 0xd57   : > { %s2762_s10 = sld [smem:[#allocation13_spill]]  ;;  %s2763_s11 = sld [smem:[#allocation14_spill]] }
 0xd58   : > { %s2764_s27 = smov %s2212_s28  ;;  %23 = sbr.rel (!%p21_p4) target bundleno = 11 (0xb), region = 136 }
 0xd5a   : > { %s2765_s28 = smov %s2758_s9 }
 0xd5c   : > { %s2766_s9 = smov %s2761_s18 }
 0xd5f   :  { %1529 = vsyncpa [#allocation4], 1 }
 0xd60   :  { %1531 = vsyncpa [#allocation4 + $0x1], 1 }
 0xd61   :  { %1532 = vsyncpa [#allocation6], 1 }
 0xd62   :  { %1534 = vsyncpa [#allocation6 + $0x1], 1 }

</bundles_post_ra>
